<compile_context>
chip_gen: v6e
topology: v6e:2x2x1
jax: 0.10.0
libtpu: 0.0.40
codegen_flags: <defaults>
</compile_context>

<pallas_src>
import jax
import jax.numpy as jnp
from jax import lax
from jax.experimental import pallas as pl
from jax.experimental.pallas import tpu as pltpu

# ---- problem sizes (small, consistent with the module) ----------------------
BATCH = 2
SEQ = 8          # decoder sequence length
CTX = 8          # encoder (context) sequence length
D_MODEL = 32
NUM_HEADS = 4
HEAD_DIM = D_MODEL // NUM_HEADS
DFF = 64
LN_EPS = 1e-5
NEG_INF = -1e9

# ---- packed bf16 weight slab (rows = D_MODEL), static column windows --------
_W_SA_IN = (0, 96)       # self-attn packed q|k|v in_proj (q cols pre-scaled)
_W_SA_OUT = (96, 128)    # self-attn out_proj
_W_CA_Q = (128, 160)     # cross-attn q proj (pre-scaled)
_W_CA_KV = (160, 224)    # cross-attn packed k|v proj
_W_CA_OUT = (224, 256)   # cross-attn out_proj
_W_FF1 = (256, 320)      # ffn first linear
W_SLAB_COLS = 320

# ---- packed f32 bias / LayerNorm slab: one 128-lane row per parameter -------
_P_SA_IN_B, _P_SA_OUT_B, _P_LN1_G, _P_LN1_B = 0, 1, 2, 3
_P_CA_IN_B, _P_CA_OUT_B, _P_LN2_G, _P_LN2_B = 4, 5, 6, 7
_P_FF1_B, _P_FF2_B, _P_LN3_G, _P_LN3_B = 8, 9, 10, 11
P_SLAB_ROWS, P_SLAB_COLS = 12, 128


# ---- in-kernel helpers -------------------------------------------------------
def _layernorm(x, gamma, beta):
    # PyTorch LayerNorm: biased variance, eps=1e-5.  All math in f32.
    mu = jnp.mean(x, axis=-1, keepdims=True)
    var = jnp.mean((x - mu) ** 2, axis=-1, keepdims=True)
    return (x - mu) * lax.rsqrt(var + LN_EPS) * gamma + beta


def _mm(a, w):
    """MXU matmul: bf16 operands, f32 accumulation."""
    return jnp.dot(a.astype(jnp.bfloat16), w.astype(jnp.bfloat16),
                   preferred_element_type=jnp.float32)


def _attend(q2, k2, v2, bias, batch, s_len, t_len, approx_recip):
    """Multi-head attention core.

    q2: (batch*s_len, d), k2/v2: (batch*t_len, d) — already projected
    (q pre-scaled by 1/sqrt(head_dim)).  bias: (batch, s_len, t_len) or None.
    Returns (merged heads (batch*s_len, d), head-averaged probs (batch,s,t)).
    """
    H, hd = NUM_HEADS, HEAD_DIM

    def split_heads(z, n):
        # (rows, H*hd) -> (H*batch, n, hd): small lane-slice/stack relayout
        zh = jnp.stack([z[:, h * hd:(h + 1) * hd] for h in range(H)], axis=0)
        return zh.reshape(H * batch, n, hd)

    q = split_heads(q2, s_len)
    k = split_heads(k2, t_len)
    v = split_heads(v2, t_len)

    # scores: one batched contraction over all (head, batch) pairs
    s = jnp.einsum('nqd,nkd->nqk', q.astype(jnp.bfloat16), k.astype(jnp.bfloat16),
                   preferred_element_type=jnp.float32)           # (H*B, S, T)
    s = s.reshape(H, batch, s_len, t_len)
    if bias is not None:
        s = s + bias[None]
    s = s - jnp.max(s, axis=-1, keepdims=True)
    e = jnp.exp(s)
    denom = jnp.sum(e, axis=-1, keepdims=True)
    if approx_recip:
        p = e * pl.reciprocal(denom, approx=True)   # EUP slot, internal use only
    else:
        p = e / denom                               # exact: probs are returned

    o = jnp.einsum('nqk,nkd->nqd',
                   p.reshape(H * batch, s_len, t_len).astype(jnp.bfloat16),
                   v.astype(jnp.bfloat16),
                   preferred_element_type=jnp.float32)           # (H*B, S, hd)
    o = o.reshape(H, batch * s_len, hd)
    # head merge back to (rows, H*hd) — one small lane concat
    merged = jnp.concatenate([o[h] for h in range(H)], axis=-1)  # (B*S, d)
    return merged, jnp.mean(p, axis=0)                           # (B, S, T)


# ---- the fused decoder-layer kernel ------------------------------------------
def decoder_layer_kernel(pad_ref, x_ref, ctx_ref, w_ref, w2_ref, p_ref,
                         out_ref, attn_ref):
    batch, s_len = pad_ref.shape              # (B, S) additive key-padding bias
    t_len = ctx_ref.shape[0] // batch
    d = D_MODEL

    x = x_ref[...]                            # (B*S, d) f32, batch-major rows
    ctx = ctx_ref[...]                        # (B*T, d) f32

    # additive self-attention bias built in-kernel: causal (iota) + key padding
    qi = lax.broadcasted_iota(jnp.int32, (s_len, s_len), 0)
    ki = lax.broadcasted_iota(jnp.int32, (s_len, s_len), 1)
    causal = jnp.where(qi >= ki, 0.0, NEG_INF)
    self_bias = causal[None, :, :] + pad_ref[...][:, None, :]    # (B, S, S)

    def w(win):
        lo, hi = win
        return w_ref[:, lo:hi]

    def prow(r, width):
        return p_ref[r:r + 1, 0:width]

    # 1) causal self-attention (one packed QKV matmul) + residual + LayerNorm
    qkv = _mm(x, w(_W_SA_IN)) + prow(_P_SA_IN_B, 3 * d)          # (B*S, 3d)
    sa_o, _ = _attend(qkv[:, 0:d], qkv[:, d:2 * d], qkv[:, 2 * d:3 * d],
                      self_bias, batch, s_len, s_len, approx_recip=True)
    sa = _mm(sa_o, w(_W_SA_OUT)) + prow(_P_SA_OUT_B, d)
    x = _layernorm(x + sa, prow(_P_LN1_G, d), prow(_P_LN1_B, d))

    # 2) cross-attention over the encoder context + residual + LayerNorm
    q = _mm(x, w(_W_CA_Q)) + p_ref[_P_CA_IN_B:_P_CA_IN_B + 1, 0:d]
    kv = _mm(ctx, w(_W_CA_KV)) + p_ref[_P_CA_IN_B:_P_CA_IN_B + 1, d:3 * d]
    ca_o, attn = _attend(q, kv[:, 0:d], kv[:, d:2 * d],
                         None, batch, s_len, t_len, approx_recip=False)
    ca = _mm(ca_o, w(_W_CA_OUT)) + prow(_P_CA_OUT_B, d)
    x = _layernorm(x + ca, prow(_P_LN2_G, d), prow(_P_LN2_B, d))

    # 3) feed-forward (Linear -> ReLU -> Linear) + residual + LayerNorm
    # TODO(synk): dropout layers are inference-mode identities (not lowered).
    h = jnp.maximum(_mm(x, w(_W_FF1)) + prow(_P_FF1_B, DFF), 0.0)
    y = _mm(h, w2_ref[...]) + prow(_P_FF2_B, d)
    x = _layernorm(x + y, prow(_P_LN3_G, d), prow(_P_LN3_B, d))

    # direct block stores (small outputs: no lane-flatten relayout)
    out_ref[...] = x.astype(out_ref.dtype)          # (B*S, d)
    attn_ref[...] = attn.astype(attn_ref.dtype)     # (B, S, T)


# ---- wrapper-side parameter packing (plain XLA, runs once / fused under jit) --
def _pack_params(params):
    (sa_w, sa_b, sa_wo, sa_bo, g1, b1,
     ca_w, ca_b, ca_wo, ca_bo, g2, b2,
     w1, fb1, w2, fb2, g3, b3) = [jnp.asarray(p, jnp.float32) for p in params]
    d = D_MODEL
    scale = 1.0 / (HEAD_DIM ** 0.5)

    def fold_q(a):   # fold 1/sqrt(head_dim) into the q projection (first d cols)
        return jnp.concatenate([a[..., :d] * scale, a[..., d:]], axis=-1)

    w_slab = jnp.concatenate(
        [fold_q(sa_w), sa_wo, fold_q(ca_w), ca_wo, w1], axis=1
    ).astype(jnp.bfloat16)                      # (d, 320) bf16
    w2_slab = w2.astype(jnp.bfloat16)           # (DFF, d) bf16

    def row(v):
        v = v.reshape(1, -1)
        return jnp.pad(v, ((0, 0), (0, P_SLAB_COLS - v.shape[1])))

    p_slab = jnp.concatenate([
        row(fold_q(sa_b)), row(sa_bo), row(g1), row(b1),
        row(fold_q(ca_b)), row(ca_bo), row(g2), row(b2),
        row(fb1), row(fb2), row(g3), row(b3),
    ], axis=0)                                   # (12, 128) f32
    return w_slab, w2_slab, p_slab


def decoder_layer(x, context, key_padding_mask, params):
    """x: (B, S, d); context: (B, T, d); key_padding_mask: (B, S) bool (True = pad).

    Returns (out (B, S, d) f32, head-averaged cross-attn probs (B, S, T) f32).
    """
    B, S, d = x.shape
    T = context.shape[1]
    w_slab, w2_slab, p_slab = _pack_params(params)

    # O(B*S) additive key-padding bias; causal part is generated in-kernel.
    pad_bias = jnp.where(key_padding_mask, NEG_INF, 0.0).astype(jnp.float32)
    x2 = x.reshape(B * S, d).astype(jnp.float32)
    ctx2 = context.reshape(B * T, d).astype(jnp.float32)

    in_specs = [
        pl.BlockSpec((B, S), lambda i: (0, 0)),                       # pad bias
        pl.BlockSpec((B * S, d), lambda i: (0, 0)),                   # x rows
        pl.BlockSpec((B * T, d), lambda i: (0, 0)),                   # context rows
        pl.BlockSpec((d, W_SLAB_COLS), lambda i: (0, 0)),             # bf16 W slab
        pl.BlockSpec((DFF, d), lambda i: (0, 0)),                     # ffn W2
        pl.BlockSpec((P_SLAB_ROWS, P_SLAB_COLS), lambda i: (0, 0)),   # f32 bias/LN slab
    ]
    out_specs = (
        pl.BlockSpec((B * S, d), lambda i: (0, 0)),
        pl.BlockSpec((B, S, T), lambda i: (0, 0, 0)),
    )
    out_shape = (
        jax.ShapeDtypeStruct((B * S, d), jnp.float32),
        jax.ShapeDtypeStruct((B, S, T), jnp.float32),
    )

    # Single program for the whole batch: at these sizes the kernel is
    # launch/DMA-latency bound, so splitting across cores only duplicates the
    # prologue (applies to v5e/v6e/v7x alike).
    out2, attn = pl.pallas_call(
        decoder_layer_kernel,
        grid=(1,),
        in_specs=in_specs,
        out_specs=out_specs,
        out_shape=out_shape,
        compiler_params=pltpu.CompilerParams(dimension_semantics=("arbitrary",)),
    )(pad_bias, x2, ctx2, w_slab, w2_slab, p_slab)

    return out2.reshape(B, S, d), attn


# ---- deterministic parameter init (PyTorch-style f32 parameters) --------------
def init_params(key):
    ks = jax.random.split(key, 18)
    d = D_MODEL
    w = lambda k, shape: 0.02 * jax.random.normal(k, shape, jnp.float32)
    b = lambda k, shape: 0.05 * jax.random.normal(k, shape, jnp.float32)
    g = lambda k, shape: 1.0 + 0.05 * jax.random.normal(k, shape, jnp.float32)
    return (
        # causal self-attention (packed q|k|v in_proj), out_proj, LayerNorm1
        w(ks[0], (d, 3 * d)), b(ks[1], (1, 3 * d)), w(ks[2], (d, d)), b(ks[3], (1, d)),
        g(ks[4], (1, d)), b(ks[5], (1, d)),
        # cross-attention (packed q|k|v in_proj), out_proj, LayerNorm2
        w(ks[6], (d, 3 * d)), b(ks[7], (1, 3 * d)), w(ks[8], (d, d)), b(ks[9], (1, d)),
        g(ks[10], (1, d)), b(ks[11], (1, d)),
        # feed-forward, LayerNorm3
        w(ks[12], (d, DFF)), b(ks[13], (1, DFF)), w(ks[14], (DFF, d)), b(ks[15], (1, d)),
        g(ks[16], (1, d)), b(ks[17], (1, d)),
    )


# ---- pure-JAX f32 reference (same math, for a sanity check) -------------------
def _ref_one(x, ctx, pad_bias_row, params):
    (sa_w, sa_b, sa_wo, sa_bo, g1, b1,
     ca_w, ca_b, ca_wo, ca_bo, g2, b2,
     w1, fb1, w2, fb2, g3, b3) = [jnp.asarray(p, jnp.float32) for p in params]

    def ln(v, g, b):
        mu = v.mean(-1, keepdims=True)
        var = ((v - mu) ** 2).mean(-1, keepdims=True)
        return (v - mu) / jnp.sqrt(var + LN_EPS) * g + b

    def mha(q_in, kv_in, w_in, b_in, w_o, b_o, bias):
        d = q_in.shape[-1]
        q = q_in @ w_in[:, :d] + b_in[:, :d]
        k = kv_in @ w_in[:, d:2 * d] + b_in[:, d:2 * d]
        v = kv_in @ w_in[:, 2 * d:] + b_in[:, 2 * d:]
        outs, psum = [], 0.0
        for h in range(NUM_HEADS):
            sl = slice(h * HEAD_DIM, (h + 1) * HEAD_DIM)
            s = (q[:, sl] @ k[:, sl].T) / (HEAD_DIM ** 0.5)
            if bias is not None:
                s = s + bias
            p = jax.nn.softmax(s, axis=-1)
            outs.append(p @ v[:, sl])
            psum = psum + p
        return jnp.concatenate(outs, -1) @ w_o + b_o, psum / NUM_HEADS

    S = x.shape[0]
    causal = jnp.where(jnp.arange(S)[:, None] >= jnp.arange(S)[None, :], 0.0, NEG_INF)
    sa, _ = mha(x, x, sa_w, sa_b, sa_wo, sa_bo, causal + pad_bias_row)
    x = ln(x + sa, g1, b1)
    ca, attn = mha(x, ctx, ca_w, ca_b, ca_wo, ca_bo, None)
    x = ln(x + ca, g2, b2)
    y = jnp.maximum(x @ w1 + fb1, 0.0) @ w2 + fb2
    return ln(x + y, g3, b3), attn


if __name__ == "__main__":
    key = jax.random.PRNGKey(0)
    kx, kc, kp = jax.random.split(key, 3)
    x = jax.random.normal(kx, (BATCH, SEQ, D_MODEL), jnp.float32)
    context = jax.random.normal(kc, (BATCH, CTX, D_MODEL), jnp.float32)
    # PyTorch convention: True = padded position (ignored as self-attention key)
    key_padding_mask = jnp.zeros((BATCH, SEQ), dtype=bool).at[1, SEQ - 2:].set(True)
    params = init_params(kp)

    run = jax.jit(decoder_layer)
    out, attn_scores = run(x, context, key_padding_mask, params)
    jax.block_until_ready((out, attn_scores))

    # sanity-check against a pure-JAX f32 reference (kernel uses bf16 MXU
    # operands, so compare with a modest tolerance)
    pad_bias = jnp.where(key_padding_mask, NEG_INF, 0.0)[:, None, :]
    ref_out, ref_attn = jax.vmap(
        lambda xb, cb, pb: _ref_one(xb, cb, pb, params))(x, context, pad_bias)
    assert jnp.allclose(out, ref_out, atol=2e-2, rtol=2e-2), \
        float(jnp.max(jnp.abs(out - ref_out)))
    assert jnp.allclose(attn_scores, ref_attn, atol=2e-2, rtol=2e-2), \
        float(jnp.max(jnp.abs(attn_scores - ref_attn)))

    print("KERNEL_OK")
</pallas_src>

<mosaic_0001>
module attributes {stable_mosaic.version = 11 : i64} {
  func.func @decoder_layer_kernel(%arg0: i32, %arg1: memref<2x8xf32, #tpu.memory_space<vmem>>, %arg2: memref<16x32xf32, #tpu.memory_space<vmem>>, %arg3: memref<16x32xf32, #tpu.memory_space<vmem>>, %arg4: memref<32x320xbf16, #tpu.memory_space<vmem>>, %arg5: memref<64x32xbf16, #tpu.memory_space<vmem>>, %arg6: memref<12x128xf32, #tpu.memory_space<vmem>>, %arg7: memref<16x32xf32, #tpu.memory_space<vmem>>, %arg8: memref<2x8x8xf32, #tpu.memory_space<vmem>>) attributes {dimension_semantics = [#tpu.dimension_semantics<arbitrary>], iteration_bounds = array<i64: 1>, scalar_prefetch = 0 : i64, scratch_operands = 0 : i64, tpu.core_type = #tpu.core_type<tc>, window_params = [{pipeline_mode = #tpu.pipeline_mode<synchronous>, transform_indices = @transform_0, window_bounds = array<i64: 2, 8>}, {pipeline_mode = #tpu.pipeline_mode<synchronous>, transform_indices = @transform_1, window_bounds = array<i64: 16, 32>}, {pipeline_mode = #tpu.pipeline_mode<synchronous>, transform_indices = @transform_2, window_bounds = array<i64: 16, 32>}, {pipeline_mode = #tpu.pipeline_mode<synchronous>, transform_indices = @transform_3, window_bounds = array<i64: 32, 320>}, {pipeline_mode = #tpu.pipeline_mode<synchronous>, transform_indices = @transform_4, window_bounds = array<i64: 64, 32>}, {pipeline_mode = #tpu.pipeline_mode<synchronous>, transform_indices = @transform_5, window_bounds = array<i64: 12, 128>}, {pipeline_mode = #tpu.pipeline_mode<synchronous>, transform_indices = @transform_6, window_bounds = array<i64: 16, 32>}, {pipeline_mode = #tpu.pipeline_mode<synchronous>, transform_indices = @transform_7, window_bounds = array<i64: 2, 8, 8>}]} {
    %c0 = arith.constant 0 : index
    %c0_0 = arith.constant 0 : index
    %0 = vector.load %arg2[%c0, %c0_0] : memref<16x32xf32, #tpu.memory_space<vmem>>, vector<16x32xf32>
    %c0_1 = arith.constant 0 : index
    %c0_2 = arith.constant 0 : index
    %1 = vector.load %arg3[%c0_1, %c0_2] : memref<16x32xf32, #tpu.memory_space<vmem>>, vector<16x32xf32>
    %2 = tpu.iota {dimensions = array<i32: 0>} : vector<8x8xi32>
    %3 = tpu.iota {dimensions = array<i32: 1>} : vector<8x8xi32>
    %4 = arith.cmpi sge, %2, %3 : vector<8x8xi32>
    %cst = arith.constant 0.000000e+00 : f32
    %cst_3 = arith.constant -1.000000e+09 : f32
    %5 = vector.broadcast %cst : f32 to vector<8x8xf32>
    %6 = vector.broadcast %cst_3 : f32 to vector<8x8xf32>
    %7 = arith.select %4, %5, %6 : vector<8x8xi1>, vector<8x8xf32>
    %8 = vector.shape_cast %7 : vector<8x8xf32> to vector<1x8x8xf32>
    %c0_4 = arith.constant 0 : index
    %c0_5 = arith.constant 0 : index
    %9 = vector.load %arg1[%c0_4, %c0_5] : memref<2x8xf32, #tpu.memory_space<vmem>>, vector<2x8xf32>
    %10 = vector.shape_cast %9 : vector<2x8xf32> to vector<2x1x8xf32>
    %11 = vector.broadcast %8 : vector<1x8x8xf32> to vector<2x8x8xf32>
    %12 = vector.broadcast %10 : vector<2x1x8xf32> to vector<2x8x8xf32>
    %13 = arith.addf %11, %12 : vector<2x8x8xf32>
    %c0_6 = arith.constant 0 : index
    %c0_7 = arith.constant 0 : index
    %14 = vector.load %arg4[%c0_6, %c0_7] : memref<32x320xbf16, #tpu.memory_space<vmem>>, vector<32x96xbf16>
    %15 = arith.truncf %0 : vector<16x32xf32> to vector<16x32xbf16>
    %cst_8 = arith.constant dense<0.000000e+00> : vector<16x96xf32>
    %16 = tpu.matmul %15, %14, %cst_8 {dimension_numbers = #tpu.dot_dimension_numbers<[1], [0], [0], [1], [0, 0, 1, 1], [], []>} : vector<16x32xbf16>, vector<32x96xbf16>, vector<16x96xf32> -> vector<16x96xf32>
    %c0_9 = arith.constant 0 : index
    %c0_10 = arith.constant 0 : index
    %17 = vector.load %arg6[%c0_9, %c0_10] : memref<12x128xf32, #tpu.memory_space<vmem>>, vector<1x96xf32>
    %18 = vector.broadcast %17 : vector<1x96xf32> to vector<16x96xf32>
    %19 = arith.addf %16, %18 : vector<16x96xf32>
    %20 = vector.extract_strided_slice %19 {offsets = [0, 0], sizes = [16, 32], strides = [1, 1]} : vector<16x96xf32> to vector<16x32xf32>
    %21 = vector.extract_strided_slice %19 {offsets = [0, 32], sizes = [16, 32], strides = [1, 1]} : vector<16x96xf32> to vector<16x32xf32>
    %22 = vector.extract_strided_slice %19 {offsets = [0, 64], sizes = [16, 32], strides = [1, 1]} : vector<16x96xf32> to vector<16x32xf32>
    %23 = vector.extract_strided_slice %20 {offsets = [0, 0], sizes = [16, 8], strides = [1, 1]} : vector<16x32xf32> to vector<16x8xf32>
    %24 = vector.extract_strided_slice %20 {offsets = [0, 8], sizes = [16, 8], strides = [1, 1]} : vector<16x32xf32> to vector<16x8xf32>
    %25 = vector.extract_strided_slice %20 {offsets = [0, 16], sizes = [16, 8], strides = [1, 1]} : vector<16x32xf32> to vector<16x8xf32>
    %26 = vector.extract_strided_slice %20 {offsets = [0, 24], sizes = [16, 8], strides = [1, 1]} : vector<16x32xf32> to vector<16x8xf32>
    %27 = vector.shape_cast %23 : vector<16x8xf32> to vector<1x16x8xf32>
    %28 = vector.shape_cast %24 : vector<16x8xf32> to vector<1x16x8xf32>
    %29 = vector.shape_cast %25 : vector<16x8xf32> to vector<1x16x8xf32>
    %30 = vector.shape_cast %26 : vector<16x8xf32> to vector<1x16x8xf32>
    %31 = tpu.concatenate %27, %28, %29, %30 in 0 : vector<1x16x8xf32>, vector<1x16x8xf32>, vector<1x16x8xf32>, vector<1x16x8xf32> -> vector<4x16x8xf32>
    %32 = vector.shape_cast %31 : vector<4x16x8xf32> to vector<8x8x8xf32>
    %33 = vector.extract_strided_slice %21 {offsets = [0, 0], sizes = [16, 8], strides = [1, 1]} : vector<16x32xf32> to vector<16x8xf32>
    %34 = vector.extract_strided_slice %21 {offsets = [0, 8], sizes = [16, 8], strides = [1, 1]} : vector<16x32xf32> to vector<16x8xf32>
    %35 = vector.extract_strided_slice %21 {offsets = [0, 16], sizes = [16, 8], strides = [1, 1]} : vector<16x32xf32> to vector<16x8xf32>
    %36 = vector.extract_strided_slice %21 {offsets = [0, 24], sizes = [16, 8], strides = [1, 1]} : vector<16x32xf32> to vector<16x8xf32>
    %37 = vector.shape_cast %33 : vector<16x8xf32> to vector<1x16x8xf32>
    %38 = vector.shape_cast %34 : vector<16x8xf32> to vector<1x16x8xf32>
    %39 = vector.shape_cast %35 : vector<16x8xf32> to vector<1x16x8xf32>
    %40 = vector.shape_cast %36 : vector<16x8xf32> to vector<1x16x8xf32>
    %41 = tpu.concatenate %37, %38, %39, %40 in 0 : vector<1x16x8xf32>, vector<1x16x8xf32>, vector<1x16x8xf32>, vector<1x16x8xf32> -> vector<4x16x8xf32>
    %42 = vector.shape_cast %41 : vector<4x16x8xf32> to vector<8x8x8xf32>
    %43 = vector.extract_strided_slice %22 {offsets = [0, 0], sizes = [16, 8], strides = [1, 1]} : vector<16x32xf32> to vector<16x8xf32>
    %44 = vector.extract_strided_slice %22 {offsets = [0, 8], sizes = [16, 8], strides = [1, 1]} : vector<16x32xf32> to vector<16x8xf32>
    %45 = vector.extract_strided_slice %22 {offsets = [0, 16], sizes = [16, 8], strides = [1, 1]} : vector<16x32xf32> to vector<16x8xf32>
    %46 = vector.extract_strided_slice %22 {offsets = [0, 24], sizes = [16, 8], strides = [1, 1]} : vector<16x32xf32> to vector<16x8xf32>
    %47 = vector.shape_cast %43 : vector<16x8xf32> to vector<1x16x8xf32>
    %48 = vector.shape_cast %44 : vector<16x8xf32> to vector<1x16x8xf32>
    %49 = vector.shape_cast %45 : vector<16x8xf32> to vector<1x16x8xf32>
    %50 = vector.shape_cast %46 : vector<16x8xf32> to vector<1x16x8xf32>
    %51 = tpu.concatenate %47, %48, %49, %50 in 0 : vector<1x16x8xf32>, vector<1x16x8xf32>, vector<1x16x8xf32>, vector<1x16x8xf32> -> vector<4x16x8xf32>
    %52 = vector.shape_cast %51 : vector<4x16x8xf32> to vector<8x8x8xf32>
    %53 = arith.truncf %32 : vector<8x8x8xf32> to vector<8x8x8xbf16>
    %54 = arith.truncf %42 : vector<8x8x8xf32> to vector<8x8x8xbf16>
    "tpu.trace_start"() <{level = 10 : i32, message = "nqd,nkd->nqk"}> : () -> ()
    %cst_11 = arith.constant dense<0.000000e+00> : vector<8x8x8xf32>
    %55 = tpu.matmul %53, %54, %cst_11 {dimension_numbers = #tpu.dot_dimension_numbers<[2], [2], [1], [1], [0, 0, 0, 1, 1, 1], [0], [0]>} : vector<8x8x8xbf16>, vector<8x8x8xbf16>, vector<8x8x8xf32> -> vector<8x8x8xf32>
    "tpu.trace_stop"() : () -> ()
    %56 = vector.shape_cast %55 : vector<8x8x8xf32> to vector<4x2x8x8xf32>
    %57 = vector.shape_cast %13 : vector<2x8x8xf32> to vector<1x2x8x8xf32>
    %58 = vector.broadcast %57 : vector<1x2x8x8xf32> to vector<4x2x8x8xf32>
    %59 = arith.addf %56, %58 : vector<4x2x8x8xf32>
    %cst_12 = arith.constant dense<0xFF800000> : vector<4x2x8xf32>
    %60 = vector.multi_reduction <maximumf>, %59, %cst_12 [3] : vector<4x2x8x8xf32> to vector<4x2x8xf32>
    %61 = vector.shape_cast %60 : vector<4x2x8xf32> to vector<4x2x8x1xf32>
    %62 = vector.broadcast %61 : vector<4x2x8x1xf32> to vector<4x2x8x8xf32>
    %63 = arith.subf %59, %62 : vector<4x2x8x8xf32>
    %64 = math.exp %63 : vector<4x2x8x8xf32>
    %cst_13 = arith.constant dense<0.000000e+00> : vector<4x2x8xf32>
    %65 = vector.multi_reduction <add>, %64, %cst_13 [3] : vector<4x2x8x8xf32> to vector<4x2x8xf32>
    %66 = vector.shape_cast %65 : vector<4x2x8xf32> to vector<4x2x8x1xf32>
    %67 = tpu.reciprocal %66 {approx = true} : vector<4x2x8x1xf32> -> vector<4x2x8x1xf32>
    %68 = vector.broadcast %67 : vector<4x2x8x1xf32> to vector<4x2x8x8xf32>
    %69 = arith.mulf %64, %68 : vector<4x2x8x8xf32>
    %70 = vector.shape_cast %69 : vector<4x2x8x8xf32> to vector<8x8x8xf32>
    %71 = arith.truncf %70 : vector<8x8x8xf32> to vector<8x8x8xbf16>
    %72 = arith.truncf %52 : vector<8x8x8xf32> to vector<8x8x8xbf16>
    "tpu.trace_start"() <{level = 10 : i32, message = "nqk,nkd->nqd"}> : () -> ()
    %cst_14 = arith.constant dense<0.000000e+00> : vector<8x8x8xf32>
    %73 = tpu.matmul %71, %72, %cst_14 {dimension_numbers = #tpu.dot_dimension_numbers<[2], [1], [1], [2], [0, 0, 0, 1, 1, 2], [0], [0]>} : vector<8x8x8xbf16>, vector<8x8x8xbf16>, vector<8x8x8xf32> -> vector<8x8x8xf32>
    "tpu.trace_stop"() : () -> ()
    %74 = vector.shape_cast %73 : vector<8x8x8xf32> to vector<4x16x8xf32>
    %75 = vector.extract_strided_slice %74 {offsets = [0, 0, 0], sizes = [1, 16, 8], strides = [1, 1, 1]} : vector<4x16x8xf32> to vector<1x16x8xf32>
    %76 = vector.shape_cast %75 : vector<1x16x8xf32> to vector<16x8xf32>
    %77 = vector.extract_strided_slice %74 {offsets = [1, 0, 0], sizes = [1, 16, 8], strides = [1, 1, 1]} : vector<4x16x8xf32> to vector<1x16x8xf32>
    %78 = vector.shape_cast %77 : vector<1x16x8xf32> to vector<16x8xf32>
    %79 = vector.extract_strided_slice %74 {offsets = [2, 0, 0], sizes = [1, 16, 8], strides = [1, 1, 1]} : vector<4x16x8xf32> to vector<1x16x8xf32>
    %80 = vector.shape_cast %79 : vector<1x16x8xf32> to vector<16x8xf32>
    %81 = vector.extract_strided_slice %74 {offsets = [3, 0, 0], sizes = [1, 16, 8], strides = [1, 1, 1]} : vector<4x16x8xf32> to vector<1x16x8xf32>
    %82 = vector.shape_cast %81 : vector<1x16x8xf32> to vector<16x8xf32>
    %83 = tpu.concatenate %76, %78, %80, %82 in 1 : vector<16x8xf32>, vector<16x8xf32>, vector<16x8xf32>, vector<16x8xf32> -> vector<16x32xf32>
    %c0_15 = arith.constant 0 : index
    %c96 = arith.constant 96 : index
    %84 = vector.load %arg4[%c0_15, %c96] : memref<32x320xbf16, #tpu.memory_space<vmem>>, vector<32x32xbf16>
    %85 = arith.truncf %83 : vector<16x32xf32> to vector<16x32xbf16>
    %cst_16 = arith.constant dense<0.000000e+00> : vector<16x32xf32>
    %86 = tpu.matmul %85, %84, %cst_16 {dimension_numbers = #tpu.dot_dimension_numbers<[1], [0], [0], [1], [0, 0, 1, 1], [], []>} : vector<16x32xbf16>, vector<32x32xbf16>, vector<16x32xf32> -> vector<16x32xf32>
    %c1 = arith.constant 1 : index
    %c0_17 = arith.constant 0 : index
    %87 = vector.load %arg6[%c1, %c0_17] : memref<12x128xf32, #tpu.memory_space<vmem>>, vector<1x32xf32>
    %88 = vector.broadcast %87 : vector<1x32xf32> to vector<16x32xf32>
    %89 = arith.addf %86, %88 : vector<16x32xf32>
    %90 = arith.addf %0, %89 : vector<16x32xf32>
    %c2 = arith.constant 2 : index
    %c0_18 = arith.constant 0 : index
    %91 = vector.load %arg6[%c2, %c0_18] : memref<12x128xf32, #tpu.memory_space<vmem>>, vector<1x32xf32>
    %c3 = arith.constant 3 : index
    %c0_19 = arith.constant 0 : index
    %92 = vector.load %arg6[%c3, %c0_19] : memref<12x128xf32, #tpu.memory_space<vmem>>, vector<1x32xf32>
    %cst_20 = arith.constant dense<0.000000e+00> : vector<16xf32>
    %93 = vector.multi_reduction <add>, %90, %cst_20 [1] : vector<16x32xf32> to vector<16xf32>
    %94 = vector.shape_cast %93 : vector<16xf32> to vector<16x1xf32>
    %cst_21 = arith.constant 3.200000e+01 : f32
    %95 = vector.broadcast %cst_21 : f32 to vector<16x1xf32>
    %96 = arith.divf %94, %95 : vector<16x1xf32>
    %97 = vector.broadcast %96 : vector<16x1xf32> to vector<16x32xf32>
    %98 = arith.subf %90, %97 : vector<16x32xf32>
    %99 = arith.mulf %98, %98 : vector<16x32xf32>
    %cst_22 = arith.constant dense<0.000000e+00> : vector<16xf32>
    %100 = vector.multi_reduction <add>, %99, %cst_22 [1] : vector<16x32xf32> to vector<16xf32>
    %101 = vector.shape_cast %100 : vector<16xf32> to vector<16x1xf32>
    %cst_23 = arith.constant 3.200000e+01 : f32
    %102 = vector.broadcast %cst_23 : f32 to vector<16x1xf32>
    %103 = arith.divf %101, %102 : vector<16x1xf32>
    %104 = vector.broadcast %96 : vector<16x1xf32> to vector<16x32xf32>
    %105 = arith.subf %90, %104 : vector<16x32xf32>
    %cst_24 = arith.constant 9.99999974E-6 : f32
    %106 = vector.broadcast %cst_24 : f32 to vector<16x1xf32>
    %107 = arith.addf %103, %106 : vector<16x1xf32>
    %108 = math.rsqrt %107 : vector<16x1xf32>
    %109 = vector.broadcast %108 : vector<16x1xf32> to vector<16x32xf32>
    %110 = arith.mulf %105, %109 : vector<16x32xf32>
    %111 = vector.broadcast %91 : vector<1x32xf32> to vector<16x32xf32>
    %112 = arith.mulf %110, %111 : vector<16x32xf32>
    %113 = vector.broadcast %92 : vector<1x32xf32> to vector<16x32xf32>
    %114 = arith.addf %112, %113 : vector<16x32xf32>
    %c0_25 = arith.constant 0 : index
    %c128 = arith.constant 128 : index
    %115 = vector.load %arg4[%c0_25, %c128] : memref<32x320xbf16, #tpu.memory_space<vmem>>, vector<32x32xbf16>
    %116 = arith.truncf %114 : vector<16x32xf32> to vector<16x32xbf16>
    %cst_26 = arith.constant dense<0.000000e+00> : vector<16x32xf32>
    %117 = tpu.matmul %116, %115, %cst_26 {dimension_numbers = #tpu.dot_dimension_numbers<[1], [0], [0], [1], [0, 0, 1, 1], [], []>} : vector<16x32xbf16>, vector<32x32xbf16>, vector<16x32xf32> -> vector<16x32xf32>
    %c4 = arith.constant 4 : index
    %c0_27 = arith.constant 0 : index
    %118 = vector.load %arg6[%c4, %c0_27] : memref<12x128xf32, #tpu.memory_space<vmem>>, vector<1x32xf32>
    %119 = vector.broadcast %118 : vector<1x32xf32> to vector<16x32xf32>
    %120 = arith.addf %117, %119 : vector<16x32xf32>
    %c0_28 = arith.constant 0 : index
    %c160 = arith.constant 160 : index
    %121 = vector.load %arg4[%c0_28, %c160] : memref<32x320xbf16, #tpu.memory_space<vmem>>, vector<32x64xbf16>
    %122 = arith.truncf %1 : vector<16x32xf32> to vector<16x32xbf16>
    %cst_29 = arith.constant dense<0.000000e+00> : vector<16x64xf32>
    %123 = tpu.matmul %122, %121, %cst_29 {dimension_numbers = #tpu.dot_dimension_numbers<[1], [0], [0], [1], [0, 0, 1, 1], [], []>} : vector<16x32xbf16>, vector<32x64xbf16>, vector<16x64xf32> -> vector<16x64xf32>
    %c4_30 = arith.constant 4 : index
    %c32 = arith.constant 32 : index
    %124 = vector.load %arg6[%c4_30, %c32] : memref<12x128xf32, #tpu.memory_space<vmem>>, vector<1x64xf32>
    %125 = vector.broadcast %124 : vector<1x64xf32> to vector<16x64xf32>
    %126 = arith.addf %123, %125 : vector<16x64xf32>
    %127 = vector.extract_strided_slice %126 {offsets = [0, 0], sizes = [16, 32], strides = [1, 1]} : vector<16x64xf32> to vector<16x32xf32>
    %128 = vector.extract_strided_slice %126 {offsets = [0, 32], sizes = [16, 32], strides = [1, 1]} : vector<16x64xf32> to vector<16x32xf32>
    %129 = vector.extract_strided_slice %120 {offsets = [0, 0], sizes = [16, 8], strides = [1, 1]} : vector<16x32xf32> to vector<16x8xf32>
    %130 = vector.extract_strided_slice %120 {offsets = [0, 8], sizes = [16, 8], strides = [1, 1]} : vector<16x32xf32> to vector<16x8xf32>
    %131 = vector.extract_strided_slice %120 {offsets = [0, 16], sizes = [16, 8], strides = [1, 1]} : vector<16x32xf32> to vector<16x8xf32>
    %132 = vector.extract_strided_slice %120 {offsets = [0, 24], sizes = [16, 8], strides = [1, 1]} : vector<16x32xf32> to vector<16x8xf32>
    %133 = vector.shape_cast %129 : vector<16x8xf32> to vector<1x16x8xf32>
    %134 = vector.shape_cast %130 : vector<16x8xf32> to vector<1x16x8xf32>
    %135 = vector.shape_cast %131 : vector<16x8xf32> to vector<1x16x8xf32>
    %136 = vector.shape_cast %132 : vector<16x8xf32> to vector<1x16x8xf32>
    %137 = tpu.concatenate %133, %134, %135, %136 in 0 : vector<1x16x8xf32>, vector<1x16x8xf32>, vector<1x16x8xf32>, vector<1x16x8xf32> -> vector<4x16x8xf32>
    %138 = vector.shape_cast %137 : vector<4x16x8xf32> to vector<8x8x8xf32>
    %139 = vector.extract_strided_slice %127 {offsets = [0, 0], sizes = [16, 8], strides = [1, 1]} : vector<16x32xf32> to vector<16x8xf32>
    %140 = vector.extract_strided_slice %127 {offsets = [0, 8], sizes = [16, 8], strides = [1, 1]} : vector<16x32xf32> to vector<16x8xf32>
    %141 = vector.extract_strided_slice %127 {offsets = [0, 16], sizes = [16, 8], strides = [1, 1]} : vector<16x32xf32> to vector<16x8xf32>
    %142 = vector.extract_strided_slice %127 {offsets = [0, 24], sizes = [16, 8], strides = [1, 1]} : vector<16x32xf32> to vector<16x8xf32>
    %143 = vector.shape_cast %139 : vector<16x8xf32> to vector<1x16x8xf32>
    %144 = vector.shape_cast %140 : vector<16x8xf32> to vector<1x16x8xf32>
    %145 = vector.shape_cast %141 : vector<16x8xf32> to vector<1x16x8xf32>
    %146 = vector.shape_cast %142 : vector<16x8xf32> to vector<1x16x8xf32>
    %147 = tpu.concatenate %143, %144, %145, %146 in 0 : vector<1x16x8xf32>, vector<1x16x8xf32>, vector<1x16x8xf32>, vector<1x16x8xf32> -> vector<4x16x8xf32>
    %148 = vector.shape_cast %147 : vector<4x16x8xf32> to vector<8x8x8xf32>
    %149 = vector.extract_strided_slice %128 {offsets = [0, 0], sizes = [16, 8], strides = [1, 1]} : vector<16x32xf32> to vector<16x8xf32>
    %150 = vector.extract_strided_slice %128 {offsets = [0, 8], sizes = [16, 8], strides = [1, 1]} : vector<16x32xf32> to vector<16x8xf32>
    %151 = vector.extract_strided_slice %128 {offsets = [0, 16], sizes = [16, 8], strides = [1, 1]} : vector<16x32xf32> to vector<16x8xf32>
    %152 = vector.extract_strided_slice %128 {offsets = [0, 24], sizes = [16, 8], strides = [1, 1]} : vector<16x32xf32> to vector<16x8xf32>
    %153 = vector.shape_cast %149 : vector<16x8xf32> to vector<1x16x8xf32>
    %154 = vector.shape_cast %150 : vector<16x8xf32> to vector<1x16x8xf32>
    %155 = vector.shape_cast %151 : vector<16x8xf32> to vector<1x16x8xf32>
    %156 = vector.shape_cast %152 : vector<16x8xf32> to vector<1x16x8xf32>
    %157 = tpu.concatenate %153, %154, %155, %156 in 0 : vector<1x16x8xf32>, vector<1x16x8xf32>, vector<1x16x8xf32>, vector<1x16x8xf32> -> vector<4x16x8xf32>
    %158 = vector.shape_cast %157 : vector<4x16x8xf32> to vector<8x8x8xf32>
    %159 = arith.truncf %138 : vector<8x8x8xf32> to vector<8x8x8xbf16>
    %160 = arith.truncf %148 : vector<8x8x8xf32> to vector<8x8x8xbf16>
    "tpu.trace_start"() <{level = 10 : i32, message = "nqd,nkd->nqk"}> : () -> ()
    %cst_31 = arith.constant dense<0.000000e+00> : vector<8x8x8xf32>
    %161 = tpu.matmul %159, %160, %cst_31 {dimension_numbers = #tpu.dot_dimension_numbers<[2], [2], [1], [1], [0, 0, 0, 1, 1, 1], [0], [0]>} : vector<8x8x8xbf16>, vector<8x8x8xbf16>, vector<8x8x8xf32> -> vector<8x8x8xf32>
    "tpu.trace_stop"() : () -> ()
    %162 = vector.shape_cast %161 : vector<8x8x8xf32> to vector<4x2x8x8xf32>
    %cst_32 = arith.constant dense<0xFF800000> : vector<4x2x8xf32>
    %163 = vector.multi_reduction <maximumf>, %162, %cst_32 [3] : vector<4x2x8x8xf32> to vector<4x2x8xf32>
    %164 = vector.shape_cast %163 : vector<4x2x8xf32> to vector<4x2x8x1xf32>
    %165 = vector.broadcast %164 : vector<4x2x8x1xf32> to vector<4x2x8x8xf32>
    %166 = arith.subf %162, %165 : vector<4x2x8x8xf32>
    %167 = math.exp %166 : vector<4x2x8x8xf32>
    %cst_33 = arith.constant dense<0.000000e+00> : vector<4x2x8xf32>
    %168 = vector.multi_reduction <add>, %167, %cst_33 [3] : vector<4x2x8x8xf32> to vector<4x2x8xf32>
    %169 = vector.shape_cast %168 : vector<4x2x8xf32> to vector<4x2x8x1xf32>
    %170 = vector.broadcast %169 : vector<4x2x8x1xf32> to vector<4x2x8x8xf32>
    %171 = arith.divf %167, %170 : vector<4x2x8x8xf32>
    %172 = vector.shape_cast %171 : vector<4x2x8x8xf32> to vector<8x8x8xf32>
    %173 = arith.truncf %172 : vector<8x8x8xf32> to vector<8x8x8xbf16>
    %174 = arith.truncf %158 : vector<8x8x8xf32> to vector<8x8x8xbf16>
    "tpu.trace_start"() <{level = 10 : i32, message = "nqk,nkd->nqd"}> : () -> ()
    %cst_34 = arith.constant dense<0.000000e+00> : vector<8x8x8xf32>
    %175 = tpu.matmul %173, %174, %cst_34 {dimension_numbers = #tpu.dot_dimension_numbers<[2], [1], [1], [2], [0, 0, 0, 1, 1, 2], [0], [0]>} : vector<8x8x8xbf16>, vector<8x8x8xbf16>, vector<8x8x8xf32> -> vector<8x8x8xf32>
    "tpu.trace_stop"() : () -> ()
    %176 = vector.shape_cast %175 : vector<8x8x8xf32> to vector<4x16x8xf32>
    %177 = vector.extract_strided_slice %176 {offsets = [0, 0, 0], sizes = [1, 16, 8], strides = [1, 1, 1]} : vector<4x16x8xf32> to vector<1x16x8xf32>
    %178 = vector.shape_cast %177 : vector<1x16x8xf32> to vector<16x8xf32>
    %179 = vector.extract_strided_slice %176 {offsets = [1, 0, 0], sizes = [1, 16, 8], strides = [1, 1, 1]} : vector<4x16x8xf32> to vector<1x16x8xf32>
    %180 = vector.shape_cast %179 : vector<1x16x8xf32> to vector<16x8xf32>
    %181 = vector.extract_strided_slice %176 {offsets = [2, 0, 0], sizes = [1, 16, 8], strides = [1, 1, 1]} : vector<4x16x8xf32> to vector<1x16x8xf32>
    %182 = vector.shape_cast %181 : vector<1x16x8xf32> to vector<16x8xf32>
    %183 = vector.extract_strided_slice %176 {offsets = [3, 0, 0], sizes = [1, 16, 8], strides = [1, 1, 1]} : vector<4x16x8xf32> to vector<1x16x8xf32>
    %184 = vector.shape_cast %183 : vector<1x16x8xf32> to vector<16x8xf32>
    %185 = tpu.concatenate %178, %180, %182, %184 in 1 : vector<16x8xf32>, vector<16x8xf32>, vector<16x8xf32>, vector<16x8xf32> -> vector<16x32xf32>
    %cst_35 = arith.constant dense<0.000000e+00> : vector<2x8x8xf32>
    %186 = vector.multi_reduction <add>, %171, %cst_35 [0] : vector<4x2x8x8xf32> to vector<2x8x8xf32>
    %cst_36 = arith.constant 4.000000e+00 : f32
    %187 = vector.broadcast %cst_36 : f32 to vector<2x8x8xf32>
    %188 = arith.divf %186, %187 : vector<2x8x8xf32>
    %c0_37 = arith.constant 0 : index
    %c224 = arith.constant 224 : index
    %189 = vector.load %arg4[%c0_37, %c224] : memref<32x320xbf16, #tpu.memory_space<vmem>>, vector<32x32xbf16>
    %190 = arith.truncf %185 : vector<16x32xf32> to vector<16x32xbf16>
    %cst_38 = arith.constant dense<0.000000e+00> : vector<16x32xf32>
    %191 = tpu.matmul %190, %189, %cst_38 {dimension_numbers = #tpu.dot_dimension_numbers<[1], [0], [0], [1], [0, 0, 1, 1], [], []>} : vector<16x32xbf16>, vector<32x32xbf16>, vector<16x32xf32> -> vector<16x32xf32>
    %c5 = arith.constant 5 : index
    %c0_39 = arith.constant 0 : index
    %192 = vector.load %arg6[%c5, %c0_39] : memref<12x128xf32, #tpu.memory_space<vmem>>, vector<1x32xf32>
    %193 = vector.broadcast %192 : vector<1x32xf32> to vector<16x32xf32>
    %194 = arith.addf %191, %193 : vector<16x32xf32>
    %195 = arith.addf %114, %194 : vector<16x32xf32>
    %c6 = arith.constant 6 : index
    %c0_40 = arith.constant 0 : index
    %196 = vector.load %arg6[%c6, %c0_40] : memref<12x128xf32, #tpu.memory_space<vmem>>, vector<1x32xf32>
    %c7 = arith.constant 7 : index
    %c0_41 = arith.constant 0 : index
    %197 = vector.load %arg6[%c7, %c0_41] : memref<12x128xf32, #tpu.memory_space<vmem>>, vector<1x32xf32>
    %cst_42 = arith.constant dense<0.000000e+00> : vector<16xf32>
    %198 = vector.multi_reduction <add>, %195, %cst_42 [1] : vector<16x32xf32> to vector<16xf32>
    %199 = vector.shape_cast %198 : vector<16xf32> to vector<16x1xf32>
    %cst_43 = arith.constant 3.200000e+01 : f32
    %200 = vector.broadcast %cst_43 : f32 to vector<16x1xf32>
    %201 = arith.divf %199, %200 : vector<16x1xf32>
    %202 = vector.broadcast %201 : vector<16x1xf32> to vector<16x32xf32>
    %203 = arith.subf %195, %202 : vector<16x32xf32>
    %204 = arith.mulf %203, %203 : vector<16x32xf32>
    %cst_44 = arith.constant dense<0.000000e+00> : vector<16xf32>
    %205 = vector.multi_reduction <add>, %204, %cst_44 [1] : vector<16x32xf32> to vector<16xf32>
    %206 = vector.shape_cast %205 : vector<16xf32> to vector<16x1xf32>
    %cst_45 = arith.constant 3.200000e+01 : f32
    %207 = vector.broadcast %cst_45 : f32 to vector<16x1xf32>
    %208 = arith.divf %206, %207 : vector<16x1xf32>
    %209 = vector.broadcast %201 : vector<16x1xf32> to vector<16x32xf32>
    %210 = arith.subf %195, %209 : vector<16x32xf32>
    %cst_46 = arith.constant 9.99999974E-6 : f32
    %211 = vector.broadcast %cst_46 : f32 to vector<16x1xf32>
    %212 = arith.addf %208, %211 : vector<16x1xf32>
    %213 = math.rsqrt %212 : vector<16x1xf32>
    %214 = vector.broadcast %213 : vector<16x1xf32> to vector<16x32xf32>
    %215 = arith.mulf %210, %214 : vector<16x32xf32>
    %216 = vector.broadcast %196 : vector<1x32xf32> to vector<16x32xf32>
    %217 = arith.mulf %215, %216 : vector<16x32xf32>
    %218 = vector.broadcast %197 : vector<1x32xf32> to vector<16x32xf32>
    %219 = arith.addf %217, %218 : vector<16x32xf32>
    %c0_47 = arith.constant 0 : index
    %c256 = arith.constant 256 : index
    %220 = vector.load %arg4[%c0_47, %c256] : memref<32x320xbf16, #tpu.memory_space<vmem>>, vector<32x64xbf16>
    %221 = arith.truncf %219 : vector<16x32xf32> to vector<16x32xbf16>
    %cst_48 = arith.constant dense<0.000000e+00> : vector<16x64xf32>
    %222 = tpu.matmul %221, %220, %cst_48 {dimension_numbers = #tpu.dot_dimension_numbers<[1], [0], [0], [1], [0, 0, 1, 1], [], []>} : vector<16x32xbf16>, vector<32x64xbf16>, vector<16x64xf32> -> vector<16x64xf32>
    %c8 = arith.constant 8 : index
    %c0_49 = arith.constant 0 : index
    %223 = vector.load %arg6[%c8, %c0_49] : memref<12x128xf32, #tpu.memory_space<vmem>>, vector<1x64xf32>
    %224 = vector.broadcast %223 : vector<1x64xf32> to vector<16x64xf32>
    %225 = arith.addf %222, %224 : vector<16x64xf32>
    %cst_50 = arith.constant 0.000000e+00 : f32
    %226 = vector.broadcast %cst_50 : f32 to vector<16x64xf32>
    %227 = arith.maximumf %225, %226 : vector<16x64xf32>
    %c0_51 = arith.constant 0 : index
    %c0_52 = arith.constant 0 : index
    %228 = vector.load %arg5[%c0_51, %c0_52] : memref<64x32xbf16, #tpu.memory_space<vmem>>, vector<64x32xbf16>
    %229 = arith.truncf %227 : vector<16x64xf32> to vector<16x64xbf16>
    %cst_53 = arith.constant dense<0.000000e+00> : vector<16x32xf32>
    %230 = tpu.matmul %229, %228, %cst_53 {dimension_numbers = #tpu.dot_dimension_numbers<[1], [0], [0], [1], [0, 0, 1, 1], [], []>} : vector<16x64xbf16>, vector<64x32xbf16>, vector<16x32xf32> -> vector<16x32xf32>
    %c9 = arith.constant 9 : index
    %c0_54 = arith.constant 0 : index
    %231 = vector.load %arg6[%c9, %c0_54] : memref<12x128xf32, #tpu.memory_space<vmem>>, vector<1x32xf32>
    %232 = vector.broadcast %231 : vector<1x32xf32> to vector<16x32xf32>
    %233 = arith.addf %230, %232 : vector<16x32xf32>
    %234 = arith.addf %219, %233 : vector<16x32xf32>
    %c10 = arith.constant 10 : index
    %c0_55 = arith.constant 0 : index
    %235 = vector.load %arg6[%c10, %c0_55] : memref<12x128xf32, #tpu.memory_space<vmem>>, vector<1x32xf32>
    %c11 = arith.constant 11 : index
    %c0_56 = arith.constant 0 : index
    %236 = vector.load %arg6[%c11, %c0_56] : memref<12x128xf32, #tpu.memory_space<vmem>>, vector<1x32xf32>
    %cst_57 = arith.constant dense<0.000000e+00> : vector<16xf32>
    %237 = vector.multi_reduction <add>, %234, %cst_57 [1] : vector<16x32xf32> to vector<16xf32>
    %238 = vector.shape_cast %237 : vector<16xf32> to vector<16x1xf32>
    %cst_58 = arith.constant 3.200000e+01 : f32
    %239 = vector.broadcast %cst_58 : f32 to vector<16x1xf32>
    %240 = arith.divf %238, %239 : vector<16x1xf32>
    %241 = vector.broadcast %240 : vector<16x1xf32> to vector<16x32xf32>
    %242 = arith.subf %234, %241 : vector<16x32xf32>
    %243 = arith.mulf %242, %242 : vector<16x32xf32>
    %cst_59 = arith.constant dense<0.000000e+00> : vector<16xf32>
    %244 = vector.multi_reduction <add>, %243, %cst_59 [1] : vector<16x32xf32> to vector<16xf32>
    %245 = vector.shape_cast %244 : vector<16xf32> to vector<16x1xf32>
    %cst_60 = arith.constant 3.200000e+01 : f32
    %246 = vector.broadcast %cst_60 : f32 to vector<16x1xf32>
    %247 = arith.divf %245, %246 : vector<16x1xf32>
    %248 = vector.broadcast %240 : vector<16x1xf32> to vector<16x32xf32>
    %249 = arith.subf %234, %248 : vector<16x32xf32>
    %cst_61 = arith.constant 9.99999974E-6 : f32
    %250 = vector.broadcast %cst_61 : f32 to vector<16x1xf32>
    %251 = arith.addf %247, %250 : vector<16x1xf32>
    %252 = math.rsqrt %251 : vector<16x1xf32>
    %253 = vector.broadcast %252 : vector<16x1xf32> to vector<16x32xf32>
    %254 = arith.mulf %249, %253 : vector<16x32xf32>
    %255 = vector.broadcast %235 : vector<1x32xf32> to vector<16x32xf32>
    %256 = arith.mulf %254, %255 : vector<16x32xf32>
    %257 = vector.broadcast %236 : vector<1x32xf32> to vector<16x32xf32>
    %258 = arith.addf %256, %257 : vector<16x32xf32>
    %c0_62 = arith.constant 0 : index
    %c0_63 = arith.constant 0 : index
    %259 = vector.load %arg7[%c0_62, %c0_63] : memref<16x32xf32, #tpu.memory_space<vmem>>, vector<16x32xf32>
    tpu.vector_store %arg7[%c0_62, %c0_63], %258 {strides = array<i32>} : memref<16x32xf32, #tpu.memory_space<vmem>>, vector<16x32xf32>,
    %c0_64 = arith.constant 0 : index
    %c0_65 = arith.constant 0 : index
    %c0_66 = arith.constant 0 : index
    %260 = vector.load %arg8[%c0_64, %c0_65, %c0_66] : memref<2x8x8xf32, #tpu.memory_space<vmem>>, vector<2x8x8xf32>
    tpu.vector_store %arg8[%c0_64, %c0_65, %c0_66], %188 {strides = array<i32>} : memref<2x8x8xf32, #tpu.memory_space<vmem>>, vector<2x8x8xf32>,
    return
  }
  func.func @transform_0(%arg0: i32) -> (i32, i32) {
    %c0_i32 = arith.constant 0 : i32
    %c0_i32_0 = arith.constant 0 : i32
    %c0_i32_1 = arith.constant 0 : i32
    return %c0_i32, %c0_i32_0 : i32, i32
  }
  func.func @transform_1(%arg0: i32) -> (i32, i32) {
    %c0_i32 = arith.constant 0 : i32
    %c0_i32_0 = arith.constant 0 : i32
    %c0_i32_1 = arith.constant 0 : i32
    return %c0_i32, %c0_i32_0 : i32, i32
  }
  func.func @transform_2(%arg0: i32) -> (i32, i32) {
    %c0_i32 = arith.constant 0 : i32
    %c0_i32_0 = arith.constant 0 : i32
    %c0_i32_1 = arith.constant 0 : i32
    return %c0_i32, %c0_i32_0 : i32, i32
  }
  func.func @transform_3(%arg0: i32) -> (i32, i32) {
    %c0_i32 = arith.constant 0 : i32
    %c0_i32_0 = arith.constant 0 : i32
    %c0_i32_1 = arith.constant 0 : i32
    return %c0_i32, %c0_i32_0 : i32, i32
  }
  func.func @transform_4(%arg0: i32) -> (i32, i32) {
    %c0_i32 = arith.constant 0 : i32
    %c0_i32_0 = arith.constant 0 : i32
    %c0_i32_1 = arith.constant 0 : i32
    return %c0_i32, %c0_i32_0 : i32, i32
  }
  func.func @transform_5(%arg0: i32) -> (i32, i32) {
    %c0_i32 = arith.constant 0 : i32
    %c0_i32_0 = arith.constant 0 : i32
    %c0_i32_1 = arith.constant 0 : i32
    return %c0_i32, %c0_i32_0 : i32, i32
  }
  func.func @transform_6(%arg0: i32) -> (i32, i32) {
    %c0_i32 = arith.constant 0 : i32
    %c0_i32_0 = arith.constant 0 : i32
    %c0_i32_1 = arith.constant 0 : i32
    return %c0_i32, %c0_i32_0 : i32, i32
  }
  func.func @transform_7(%arg0: i32) -> (i32, i32, i32) {
    %c0_i32 = arith.constant 0 : i32
    %c0_i32_0 = arith.constant 0 : i32
    %c0_i32_1 = arith.constant 0 : i32
    %c0_i32_2 = arith.constant 0 : i32
    return %c0_i32, %c0_i32_0, %c0_i32_1 : i32, i32, i32
  }
}

</mosaic_0001>

<bundles_post_ra>
// kernel: decoder_layer.1
= control target key start
LH: loop header
LB: loop body
LE: loop exit
PB: predicated region body
PF: predicated region fallthrough
CT: control target
= control target key end

     0   :  { %13 = vsyncpa [#allocation3], 0  ;;  %v3247_v0 = vmov 0.0   ;;  %vm3248_vm0 = vmmov 0   ;;  %vm96_vm1 = vcmask 261120   ;;  %s3849_s0 = inlined_call_operand.vmem [shape: f32[2,8], index: 0, kind: input, shape index: {}]   ;;  %s3850_s1 = inlined_call_operand.vmem [shape: f32[16,32], index: 1, kind: input, shape index: {}]   ;;  %s3851_s2 = inlined_call_operand.vmem [shape: f32[16,32], index: 2, kind: input, shape index: {}]   ;;  %s3852_s3 = inlined_call_operand.vmem [shape: bf16[32,320], index: 3, kind: input, shape index: {}]   ;;  %s3853_s4 = inlined_call_operand.vmem [shape: bf16[64,32], index: 4, kind: input, shape index: {}]   ;;  %s3854_s5 = inlined_call_operand.vmem [shape: f32[12,128], index: 5, kind: input, shape index: {}]   ;;  %s3855_s6 = inlined_call_operand.hbm [shape: f32[16,32], index: 6, kind: output, shape index: {0}]   ;;  %s3856_s7 = inlined_call_operand.hbm [shape: f32[2,8,8], index: 7, kind: output, shape index: {1}]  }
   0x1   :  { %2770 = vmatprep.subr.bf16.mxu1 %v3247_v0  ;;  %v3113_v1 = vld [vmem:[%s3852_s3 + $0x18] ss:$12 sps:$4 sm:$0xff]   ;;  %2774 = vmatprep.mubr.msk.bf16.mxu1 %vm3248_vm0, %v3247_v0  ;;  %v3114_v2 = vld [vmem:[%s3852_s3] ss:$12 sps:$4 sm:$0xff]  }
   0x2   :  { %v3315_v3 = vld [vmem:[%s3850_s1] sm:$0xff]  ;;  %2784 = vmatprep.subr.bf16.mxu0 %v3247_v0  ;;  %2786 = vmatprep.mubr.msk.bf16.mxu0 %vm3248_vm0, %v3247_v0  ;;  %v3323_v4 = vld [vmem:[%s3850_s1 + $0x8] sm:$0xff] }
   0x3   :  { %2771 = vmatpush3.bf16.msra.mxu1 %v3113_v1  ;;  %v78_v5 = vpack.c.bf16 %v3323_v4, %v3315_v3 }
   0x4   :  { %2772 = vmatprep.subr.bf16.mxu1 %v3247_v0 }
   0x7   :  { %2773 = vmatpush3.bf16.msra.mxu1 %v3114_v2 }
   0x8   :  { %2778 = vmatprep.subr.bf16.mxu1 %v3247_v0 }
   0xa   :  { %2775 = vmatmul.mubr.msk.bf16.vlgmr.msra.gmra.mxu1 %vm96_vm1, %v78_v5 }
   0xb   :  { %2780 = vmatprep.mubr.msk.bf16.mxu1 %vm3248_vm0, %v3247_v0 }
   0xc   :  { %14 = vsyncpa [#allocation5], 0  ;;  %v2618_v7 = vld [vmem:[%s3854_s5] ss:$0 sm:$0xff]  ;;  %s3249_s1 = smov 104   ;;  %s3250_s11 = smov 120   ;;  %v32_v51 = vlaneseq }
   0xd   :  { %s3251_s12 = smov 96   ;;  %s3252_s13 = smov 112   ;;  %vm172_vm2 = vcmask 64512   ;;  %vm671_vm3 = vcmask 1043456   ;;  %v3254_v52 = vmov 1966171168  }
   0xe   :  { %s3253_s14 = smov 64   ;;  %v49_v53 = vunpack.c.l.s4 %v3254_v52  ;;  %v33_v54 = vshrl.u32 %v32_v51, 7  ;;  %v2617_v57 = vld.sshfl [vmem:[%s3849_s0] sm:$0x11 pattern:$0x75316420] }
   0xf   :  { %v35_v58 = vand.u32 127, %v32_v51  ;;  %v47_v61 = vcombine.high %v2617_v57, %v2617_v57  ;;  %v3255_v1 = vmov -1e+09   ;;  %s3256_s18 = smov 32   ;;  %s3257_s19 = smov 8   ;;  %vm1077_vm5 = vcmask 130048  }
  0x10   :  { %v50_v55 = vunpack.c.0.s8 %v49_v53  ;;  %v64_v60 = vsub.s32 0, %v33_v54  ;;  %s3258_s20 = smov 16   ;;  %s3259_s23 = smov 24   ;;  %vm1080_vm6 = vcmask 195584   ;;  %vm2494_vm7 = vcmask 523264  }
  0x11   :  { %vm36_vm4 = vcmp.ge.s32.totalorder %v33_v54, %v35_v58 }
  0x12   :  { %v53_v56 = vsub.s32 %v50_v55, %v33_v54  ;;  %v37_v2 = vsel %vm36_vm4, 0.0, %v3255_v1 }
  0x14   :  { %v54_v59 = vrot.slane %v2617_v57, %v53_v56  ;;  %v61_v63 = vrot.slane %v47_v61, %v53_v56 }
  0x16   :  { %v65_v62 = vrot.slane %v54_v59, %v64_v60 }
  0x18   :  { %v72_v5 = vadd.f32 %v65_v62, %v37_v2 }
  0xca   :  { %v134_v6 = vpop.f32.mrf.mxu1 }
  0xcb   :  { %v135_v10 = vadd.f32 %v2618_v7, %v134_v6  ;;  %v69_v6 = vrot.slane %v61_v63, %v64_v60 }
  0xcc   :  { %v2776_v8 = vpop.f32.mrf.mxu1 }
  0xcd   :  { %v161_v14 = vpack.c.bf16 %v135_v10, %v135_v10 }
  0xce   :  { %v137_v9 = vpop.f32.mrf.mxu1 }
  0xcf   :  { %v138_v11 = vadd.f32 %v2618_v7, %v137_v9  ;;  %v73_v9 = vadd.f32 %v69_v6, %v37_v2 }
  0xd0   :  { %v2777_v12 = vpop.f32.mrf.mxu1 }
  0xd1   :  { %v3048_v13 = vpack.i.bf16 %v138_v11, %v135_v10  ;;  %v162_v15 = vpack.c.bf16 %v138_v11, %v138_v11 }
  0xd3   :  { %3049 = vrot.lane.b32.xlu1 %v3048_v13, %s3249_s1  ;;  %3039 = vrot.lane.b32.xlu0 %v3048_v13, %s3250_s11 }
  0xd7   :  { %170 = vrot.lane.b32.xlu1 %v161_v14, %s3251_s12  ;;  %3044 = vrot.lane.b32.xlu0 %v3048_v13, %s3252_s13 }
  0xdb   :  { %220 = vrot.lane.b32.xlu0 %v162_v15, %s3251_s12 }
 0x145   :  { %v3050_v16 = vpop.permute.xlu1 %3049  ;;  %v3040_v17 = vpop.permute.xlu0 %3039 }
 0x146   :  { %v3042_v18 = vunpack.i.h.bf16 %v3040_v17  ;;  %v3041_v19 = vunpack.i.l.bf16 %v3040_v17  ;;  %v3051_v27 = vunpack.i.l.bf16 %v3050_v16  ;;  %v3052_v30 = vunpack.i.h.bf16 %v3050_v16 }
 0x148   :  { %v3340_v20 = vpack.c.bf16 %v3042_v18, %v3042_v18  ;;  %v3342_v21 = vpack.c.bf16 %v3041_v19, %v3041_v19  ;;  %v3359_v33 = vpack.c.bf16 %v3051_v27, %v3051_v27  ;;  %v3362_v34 = vpack.c.bf16 %v3052_v30, %v3052_v30 }
 0x149   :  { %v171_v22 = vpop.permute.xlu1 %170  ;;  %v3045_v23 = vpop.permute.xlu0 %3044 }
 0x14a   :  { %v177_v24 = vsel %vm172_vm2, %v171_v22, 0  ;;  %v3047_v25 = vunpack.i.h.bf16 %v3045_v23  ;;  %v3046_v26 = vunpack.i.l.bf16 %v3045_v23  ;;  %269 = vrot.lane.b32.xlu1 %v3342_v21, %s3251_s12  ;;  %318 = vrot.lane.b32.xlu0 %v3340_v20, %s3251_s12 }
 0x14b   :  { %2779 = vmatpush3.bf16.xpose.msra.mxu1 %v177_v24 }
 0x14c   :  { %v3349_v28 = vpack.c.bf16 %v3047_v25, %v3047_v25  ;;  %v3351_v29 = vpack.c.bf16 %v3046_v26, %v3046_v26  ;;  %2790 = vmatprep.subr.bf16.mxu1 %v3247_v0 }
 0x14d   :  { %v221_v31 = vpop.permute.xlu0 %220 }
 0x14e   :  { %367 = vrot.lane.b32.xlu1 %v3351_v29, %s3251_s12  ;;  %416 = vrot.lane.b32.xlu0 %v3349_v28, %s3251_s12  ;;  %v226_v32 = vsel %vm172_vm2, %v221_v31, 0 }
 0x14f   :  { %2785 = vmatpush3.bf16.xpose.msra.mxu0 %v226_v32 }
 0x150   :  { %2796 = vmatprep.subr.bf16.mxu0 %v3247_v0 }
 0x152   :  { %2781 = vmatmul.mubr.msk.bf16.vlgmr.msra.gmra.mxu1 %vm172_vm2, %v161_v14  ;;  %465 = vrot.lane.b32.xlu1 %v3359_v33, %s3251_s12 }
 0x153   :  { %514 = vrot.lane.b32.xlu0 %v3362_v34, %s3251_s12  ;;  %2792 = vmatprep.mubr.msk.bf16.mxu1 %vm3248_vm0, %v3247_v0 }
 0x156   :  { %715 = vrot.lane.b32.xlu1 %v162_v15, %s3253_s14  ;;  %2787 = vmatmul.mubr.msk.bf16.vlgmr.msra.gmra.mxu0 %vm172_vm2, %v162_v15 }
 0x157   :  { %666 = vrot.lane.b32.xlu0 %v161_v14, %s3253_s14  ;;  %2798 = vmatprep.mubr.msk.bf16.mxu0 %vm3248_vm0, %v3247_v0 }
 0x1bc   :  { %v270_v35 = vpop.permute.xlu1 %269  ;;  %v319_v36 = vpop.permute.xlu0 %318 }
 0x1bd   :  { %v275_v37 = vsel %vm172_vm2, %v270_v35, 0  ;;  %v324_v38 = vsel %vm172_vm2, %v319_v36, 0 }
 0x1be   :  { %2791 = vmatpush3.bf16.xpose.msra.mxu1 %v275_v37  ;;  %2797 = vmatpush3.bf16.xpose.msra.mxu0 %v324_v38 }
 0x1bf   :  { %2802 = vmatprep.subr.bf16.mxu1 %v3247_v0  ;;  %2808 = vmatprep.subr.bf16.mxu0 %v3247_v0 }
 0x1c0   :  { %v368_v39 = vpop.permute.xlu1 %367  ;;  %v417_v40 = vpop.permute.xlu0 %416 }
 0x1c1   :  { %v373_v41 = vsel %vm172_vm2, %v368_v39, 0  ;;  %v422_v42 = vsel %vm172_vm2, %v417_v40, 0 }
 0x1c4   :  { %v466_v43 = vpop.permute.xlu1 %465 }
 0x1c5   :  { %2793 = vmatmul.mubr.msk.bf16.vlgmr.msra.gmra.mxu1 %vm172_vm2, %v3342_v21  ;;  %2799 = vmatmul.mubr.msk.bf16.vlgmr.msra.gmra.mxu0 %vm172_vm2, %v3340_v20  ;;  %v515_v44 = vpop.permute.xlu0 %514  ;;  %v471_v45 = vsel %vm172_vm2, %v466_v43, 0 }
 0x1c6   :  { %2803 = vmatpush3.bf16.xpose.msra.mxu1 %v373_v41  ;;  %2809 = vmatpush3.bf16.xpose.msra.mxu0 %v422_v42  ;;  %v520_v46 = vsel %vm172_vm2, %v515_v44, 0 }
 0x1c7   :  { %2804 = vmatprep.mubr.msk.bf16.mxu1 %vm3248_vm0, %v3247_v0  ;;  %2810 = vmatprep.mubr.msk.bf16.mxu0 %vm3248_vm0, %v3247_v0 }
 0x1c8   :  { %2814 = vmatprep.subr.bf16.mxu1 %v3247_v0  ;;  %2820 = vmatprep.subr.bf16.mxu0 %v3247_v0  ;;  %v716_v47 = vpop.permute.xlu1 %715 }
 0x1c9   :  { %v667_v48 = vpop.permute.xlu0 %666  ;;  %v721_v49 = vsel %vm671_vm3, %v716_v47, 0 }
 0x1ca   :  { %v673_v50 = vsel %vm671_vm3, %v667_v48, 0 }
 0x1cd   :  { %2805 = vmatmul.mubr.msk.bf16.vlgmr.msra.gmra.mxu1 %vm172_vm2, %v3351_v29  ;;  %2811 = vmatmul.mubr.msk.bf16.vlgmr.msra.gmra.mxu0 %vm172_vm2, %v3349_v28 }
 0x1ce   :  { %2815 = vmatpush3.bf16.xpose.msra.mxu1 %v471_v45  ;;  %2821 = vmatpush3.bf16.xpose.msra.mxu0 %v520_v46 }
 0x1cf   :  { %2816 = vmatprep.mubr.msk.bf16.mxu1 %vm3248_vm0, %v3247_v0  ;;  %2822 = vmatprep.mubr.msk.bf16.mxu0 %vm3248_vm0, %v3247_v0 }
 0x1d0   :  { %2826 = vmatprep.subr.bf16.mxu1 %v3247_v0  ;;  %2832 = vmatprep.subr.bf16.mxu0 %v3247_v0 }
 0x1d5   :  { %2817 = vmatmul.mubr.msk.bf16.vlgmr.msra.gmra.mxu1 %vm172_vm2, %v3359_v33  ;;  %2823 = vmatmul.mubr.msk.bf16.vlgmr.msra.gmra.mxu0 %vm172_vm2, %v3362_v34 }
 0x1d6   :  { %2827 = vmatpush3.bf16.msra.mxu1 %v673_v50  ;;  %2833 = vmatpush3.bf16.msra.mxu0 %v721_v49 }
 0x1d7   :  { %2828 = vmatprep.mubr.msk.bf16.mxu1 %vm3248_vm0, %v3247_v0  ;;  %2834 = vmatprep.mubr.msk.bf16.mxu0 %vm3248_vm0, %v3247_v0 }
 0x1d8   :  { %2838 = vmatprep.subr.bf16.mxu1 %v3247_v0  ;;  %2844 = vmatprep.subr.bf16.mxu0 %v3247_v0 }
 0x212   :  { %v213_v7 = vpop.f32.mrf.mxu1 }
 0x213   :  { %v562_v8 = vadd.f32 %v213_v7, %v72_v5 }
 0x214   :  { %v2782_v10 = vpop.f32.mrf.mxu1 }
 0x215   :  { %v570_v11 = vsel %vm172_vm2, %v562_v8, -inf }
 0x216   :  { %v262_v12 = vpop.f32.mrf.mxu0  ;;  %571 = vmax.xlane.f32.xlu1 %v570_v11  ;;  %v216_v13 = vpop.f32.mrf.mxu1 }
 0x217   :  { %v563_v14 = vadd.f32 %v262_v12, %v73_v9 }
 0x218   :  { %v2783_v15 = vpop.f32.mrf.mxu1  ;;  %v2788_v16 = vpop.f32.mrf.mxu0 }
 0x219   :  { %v573_v17 = vsel %vm172_vm2, %v563_v14, -inf }
 0x21a   :  { %574 = vmax.xlane.f32.xlu0 %v573_v17  ;;  %v265_v18 = vpop.f32.mrf.mxu0 }
 0x21c   :  { %v2789_v19 = vpop.f32.mrf.mxu0 }
 0x285   :  { %v311_v22 = vpop.f32.mrf.mxu1  ;;  %v360_v23 = vpop.f32.mrf.mxu0 }
 0x286   :  { %v564_v24 = vadd.f32 %v311_v22, %v72_v5  ;;  %v565_v25 = vadd.f32 %v360_v23, %v73_v9 }
 0x287   :  { %v2794_v26 = vpop.f32.mrf.mxu1  ;;  %v2800_v27 = vpop.f32.mrf.mxu0 }
 0x288   :  { %v579_v30 = vsel %vm172_vm2, %v565_v25, -inf  ;;  %v576_v31 = vsel %vm172_vm2, %v564_v24, -inf }
 0x289   :  { %v363_v32 = vpop.f32.mrf.mxu0  ;;  %580 = vmax.xlane.f32.xlu1 %v579_v30  ;;  %577 = vmax.xlane.f32.xlu0 %v576_v31  ;;  %v314_v35 = vpop.f32.mrf.mxu1 }
 0x28b   :  { %v2795_v36 = vpop.f32.mrf.mxu1  ;;  %v2801_v37 = vpop.f32.mrf.mxu0 }
 0x28d   :  { %v409_v38 = vpop.f32.mrf.mxu1  ;;  %v458_v39 = vpop.f32.mrf.mxu0 }
 0x28e   :  { %v3423_v40 = vadd.f32 %v409_v38, %v72_v5  ;;  %v567_v41 = vadd.f32 %v458_v39, %v73_v9 }
 0x28f   :  { %v2806_v42 = vpop.f32.mrf.mxu1  ;;  %v2812_v43 = vpop.f32.mrf.mxu0 }
 0x290   :  { %v585_v44 = vsel %vm172_vm2, %v567_v41, -inf  ;;  %v582_v45 = vsel %vm172_vm2, %v3423_v40, -inf }
 0x291   :  { %v461_v46 = vpop.f32.mrf.mxu0  ;;  %586 = vmax.xlane.f32.xlu1 %v585_v44  ;;  %583 = vmax.xlane.f32.xlu0 %v582_v45  ;;  %v412_v47 = vpop.f32.mrf.mxu1 }
 0x293   :  { %v2807_v48 = vpop.f32.mrf.mxu1  ;;  %v2813_v49 = vpop.f32.mrf.mxu0 }
 0x295   :  { %v507_v50 = vpop.f32.mrf.mxu1  ;;  %v556_v51 = vpop.f32.mrf.mxu0 }
 0x296   :  { %v3428_v52 = vadd.f32 %v507_v50, %v72_v5  ;;  %v569_v53 = vadd.f32 %v556_v51, %v73_v9 }
 0x297   :  { %v2818_v54 = vpop.f32.mrf.mxu1  ;;  %v2824_v55 = vpop.f32.mrf.mxu0 }
 0x298   :  { %v591_v56 = vsel %vm172_vm2, %v569_v53, -inf  ;;  %v588_v57 = vsel %vm172_vm2, %v3428_v52, -inf }
 0x299   :  { %v559_v58 = vpop.f32.mrf.mxu0  ;;  %592 = vmax.xlane.f32.xlu1 %v591_v56  ;;  %589 = vmax.xlane.f32.xlu0 %v588_v57  ;;  %v510_v59 = vpop.f32.mrf.mxu1 }
 0x29b   :  { %v2819_v60 = vpop.f32.mrf.mxu1  ;;  %v2825_v61 = vpop.f32.mrf.mxu0 }
 0x29f   :  { %v572_v62 = vpop.xlane.xlu1 %571 }
 0x2a0   :  { %v594_v1 = vsub.f32 %v562_v8, %v572_v62 }
 0x2a2   :  { %v602_v5 = vmul.f32 1.442695, %v594_v1 }
 0x2a3   :  { %v575_v63 = vpop.xlane.xlu0 %574 }
 0x2a4   :  { %v595_v2 = vsub.f32 %v563_v14, %v575_v63  ;;  %3127 = vpow2.f32 %v602_v5 }
 0x2a6   :  { %v604_v6 = vmul.f32 1.442695, %v595_v2 }
 0x2a8   :  { %3129 = vpow2.f32 %v604_v6 }
 0x2aa   :  { %763 = vrot.lane.b32.xlu1 %v3342_v21, %s3253_s14 }
 0x2af   :  { %811 = vrot.lane.b32.xlu0 %v3340_v20, %s3253_s14 }
 0x2b1   :  { %v3128_v7 = vpop.eup %3127 }
 0x2b2   :  { %v618_v11 = vsel %vm172_vm2, %v3128_v7, 0.0 }
 0x2b5   :  { %v3130_v9 = vpop.eup %3129 }
 0x2b6   :  { %v621_v10 = vsel %vm172_vm2, %v3130_v9, 0.0 }
 0x2ce   :  { %622 = vadd.xlane.f32.xlu1 %v621_v10  ;;  %619 = vadd.xlane.f32.xlu0 %v618_v11 }
 0x2df   :  { %859 = vrot.lane.b32.xlu1 %v3351_v29, %s3253_s14 }
 0x312   :  { %v581_v20 = vpop.xlane.xlu1 %580  ;;  %v578_v21 = vpop.xlane.xlu0 %577 }
 0x313   :  { %v597_v12 = vsub.f32 %v565_v25, %v581_v20  ;;  %v596_v8 = vsub.f32 %v564_v24, %v578_v21 }
 0x315   :  { %v608_v13 = vmul.f32 1.442695, %v597_v12  ;;  %v606_v14 = vmul.f32 1.442695, %v596_v8 }
 0x317   :  { %3131 = vpow2.f32 %v608_v13 }
 0x318   :  { %3133 = vpow2.f32 %v606_v14 }
 0x31a   :  { %v587_v15 = vpop.xlane.xlu1 %586  ;;  %v584_v32 = vpop.xlane.xlu0 %583 }
 0x31b   :  { %v599_v16 = vsub.f32 %v567_v41, %v587_v15  ;;  %v598_v35 = vsub.f32 %v3423_v40, %v584_v32 }
 0x31d   :  { %v612_v17 = vmul.f32 1.442695, %v599_v16  ;;  %v610_v37 = vmul.f32 1.442695, %v598_v35  ;;  %v3115_v35 = vld [vmem:[%s3852_s3 + $0x18] ss:$12 sps:$4 sm:$0xff]  }
 0x31f   :  { %3135 = vpow2.f32 %v612_v17 }
 0x322   :  { %v593_v18 = vpop.xlane.xlu1 %592  ;;  %v590_v36 = vpop.xlane.xlu0 %589 }
 0x323   :  { %v601_v19 = vsub.f32 %v569_v53, %v593_v18  ;;  %v600_v38 = vsub.f32 %v3428_v52, %v590_v36 }
 0x324   :  { %v3132_v22 = vpop.eup %3131 }
 0x325   :  { %v3441_v23 = vpop.eup %3133  ;;  %v616_v26 = vmul.f32 1.442695, %v601_v19  ;;  %v627_v29 = vsel %vm172_vm2, %v3132_v22, 0.0  ;;  %v614_v39 = vmul.f32 1.442695, %v600_v38 }
 0x326   :  { %628 = vadd.xlane.f32.xlu1 %v627_v29  ;;  %v624_v24 = vsel %vm172_vm2, %v3441_v23, 0.0  ;;  %v764_v41 = vpop.permute.xlu1 %763  ;;  %v812_v42 = vpop.permute.xlu0 %811 }
 0x327   :  { %3137 = vpow2.f32 %v616_v26  ;;  %625 = vadd.xlane.f32.xlu0 %v624_v24  ;;  %v817_v52 = vsel %vm671_vm3, %v812_v42, 0  ;;  %v769_v53 = vsel %vm671_vm3, %v764_v41, 0 }
 0x328   :  { %3139 = vpow2.f32 %v610_v37 }
 0x329   :  { %3141 = vpow2.f32 %v614_v39 }
 0x32c   :  { %v3446_v25 = vpop.eup %3135 }
 0x32d   :  { %v633_v27 = vsel %vm172_vm2, %v3446_v25, 0.0 }
 0x32e   :  { %634 = vadd.xlane.f32.xlu1 %v633_v27 }
 0x334   :  { %v3450_v30 = vpop.eup %3137 }
 0x335   :  { %v639_v31 = vsel %vm172_vm2, %v3450_v30, 0.0  ;;  %v3460_v45 = vpop.eup %3139 }
 0x336   :  { %640 = vadd.xlane.f32.xlu1 %v639_v31  ;;  %v3464_v40 = vpop.eup %3141 }
 0x33d   :  { %907 = vrot.lane.b32.xlu0 %v3349_v28, %s3253_s14  ;;  %v630_v28 = vsel %vm172_vm2, %v3460_v45, 0.0 }
 0x347   :  { %955 = vrot.lane.b32.xlu1 %v3359_v33, %s3253_s14  ;;  %v636_v33 = vsel %vm172_vm2, %v3464_v40, 0.0 }
 0x34b   :  { %1105 = vrot.lane.b32.xlu1 %v3115_v35, %s3256_s18 }
 0x357   :  { %v623_v43 = vpop.xlane.xlu1 %622  ;;  %v620_v44 = vpop.xlane.xlu0 %619 }
 0x358   :  { %3143 = vrcp.f32 %v623_v43 }
 0x359   :  { %3145 = vrcp.f32 %v620_v44 }
 0x35b   :  { %v860_v54 = vpop.permute.xlu1 %859 }
 0x35c   :  { %631 = vadd.xlane.f32.xlu0 %v630_v28 }
 0x360   :  { %637 = vadd.xlane.f32.xlu0 %v636_v33 }
 0x365   :  { %v3144_v46 = vpop.eup %3143 }
 0x366   :  { %v3146_v47 = vpop.eup %3145  ;;  %v651_v48 = vmul.f32 %v3144_v46, %v3130_v9 }
 0x367   :  { %v650_v49 = vmul.f32 %v3146_v47, %v3128_v7 }
 0x368   :  { %v659_v50 = vpack.c.bf16 %v651_v48, %v651_v48 }
 0x369   :  { %v658_v51 = vpack.c.bf16 %v650_v49, %v650_v49 }
 0x36a   :  { %2835 = vmatmul.mubr.msk.bf16.vlgmr.msra.gmra.mxu0 %vm172_vm2, %v659_v50 }
 0x36b   :  { %2829 = vmatmul.mubr.msk.bf16.vlgmr.msra.gmra.mxu1 %vm172_vm2, %v658_v51  ;;  %2845 = vmatpush3.bf16.msra.mxu0 %v817_v52 }
 0x36c   :  { %2839 = vmatpush3.bf16.msra.mxu1 %v769_v53  ;;  %2840 = vmatprep.mubr.msk.bf16.mxu1 %vm3248_vm0, %v3247_v0 }
 0x36d   :  { %2846 = vmatprep.mubr.msk.bf16.mxu0 %vm3248_vm0, %v3247_v0  ;;  %2850 = vmatprep.subr.bf16.mxu1 %v3247_v0 }
 0x36e   :  { %2856 = vmatprep.subr.bf16.mxu0 %v3247_v0 }
 0x376   :  { %1003 = vrot.lane.b32.xlu0 %v3362_v34, %s3253_s14  ;;  %v865_v34 = vsel %vm671_vm3, %v860_v54, 0 }
 0x3af   :  { %v629_v55 = vpop.xlane.xlu1 %628 }
 0x3b0   :  { %3147 = vrcp.f32 %v629_v55  ;;  %v626_v56 = vpop.xlane.xlu0 %625  ;;  %v3116_v55 = vld [vmem:[%s3852_s3] ss:$12 sps:$4 sm:$0xff]  }
 0x3b1   :  { %3149 = vrcp.f32 %v626_v56 }
 0x3b4   :  { %v908_v61 = vpop.permute.xlu0 %907 }
 0x3b5   :  { %v913_v2 = vsel %vm671_vm3, %v908_v61, 0 }
 0x3b7   :  { %v635_v57 = vpop.xlane.xlu1 %634 }
 0x3b8   :  { %3151 = vrcp.f32 %v635_v57 }
 0x3bd   :  { %v3148_v58 = vpop.eup %3147 }
 0x3be   :  { %v3150_v59 = vpop.eup %3149  ;;  %v653_v60 = vmul.f32 %v3148_v58, %v3132_v22 }
 0x3bf   :  { %v652_v62 = vmul.f32 %v3150_v59, %v3441_v23  ;;  %v641_v9 = vpop.xlane.xlu1 %640 }
 0x3c0   :  { %v661_v63 = vpack.c.bf16 %v653_v60, %v653_v60  ;;  %3153 = vrcp.f32 %v641_v9 }
 0x3c1   :  { %v660_v1 = vpack.c.bf16 %v652_v62, %v652_v62 }
 0x3c2   :  { %2847 = vmatmul.mubr.msk.bf16.vlgmr.msra.gmra.mxu0 %vm172_vm2, %v661_v63 }
 0x3c3   :  { %2841 = vmatmul.mubr.msk.bf16.vlgmr.msra.gmra.mxu1 %vm172_vm2, %v660_v1  ;;  %2857 = vmatpush3.bf16.msra.mxu0 %v913_v2  ;;  %v956_v16 = vpop.permute.xlu1 %955 }
 0x3c4   :  { %2851 = vmatpush3.bf16.msra.mxu1 %v865_v34  ;;  %2858 = vmatprep.mubr.msk.bf16.mxu0 %vm3248_vm0, %v3247_v0  ;;  %v961_v19 = vsel %vm671_vm3, %v956_v16, 0  ;;  %v2638_v16 = vld [vmem:[%s3854_s5 + $0x1] ss:$0 sm:$0xff] }
 0x3c5   :  { %v3152_v5 = vpop.eup %3151  ;;  %2868 = vmatprep.subr.bf16.mxu0 %v3247_v0  ;;  %2852 = vmatprep.mubr.msk.bf16.mxu1 %vm3248_vm0, %v3247_v0 }
 0x3c6   :  { %v655_v6 = vmul.f32 %v3152_v5, %v3446_v25  ;;  %2862 = vmatprep.subr.bf16.mxu1 %v3247_v0 }
 0x3c7   :  { %v1106_v47 = vpop.permute.xlu1 %1105 }
 0x3c8   :  { %v663_v7 = vpack.c.bf16 %v655_v6, %v655_v6 }
 0x3ca   :  { %2859 = vmatmul.mubr.msk.bf16.vlgmr.msra.gmra.mxu0 %vm172_vm2, %v663_v7 }
 0x3cb   :  { %2870 = vmatprep.mubr.msk.bf16.mxu0 %vm3248_vm0, %v3247_v0 }
 0x3cd   :  { %v3154_v11 = vpop.eup %3153 }
 0x3ce   :  { %v657_v21 = vmul.f32 %v3154_v11, %v3450_v30 }
 0x3d0   :  { %v665_v13 = vpack.c.bf16 %v657_v21, %v657_v21 }
 0x3e5   :  { %v632_v10 = vpop.xlane.xlu0 %631 }
 0x3e6   :  { %3155 = vrcp.f32 %v632_v10 }
 0x3e9   :  { %v638_v20 = vpop.xlane.xlu0 %637 }
 0x3ea   :  { %3157 = vrcp.f32 %v638_v20 }
 0x3ed   :  { %v1004_v12 = vpop.permute.xlu0 %1003 }
 0x3ee   :  { %v1009_v8 = vsel %vm671_vm3, %v1004_v12, 0 }
 0x3ef   :  { %2869 = vmatpush3.bf16.msra.mxu0 %v1009_v8 }
 0x3f0   :  { %2882 = vmatprep.subr.bf16.mxu0 %v3247_v0 }
 0x3f2   :  { %2871 = vmatmul.mubr.msk.bf16.vlgmr.msra.gmra.mxu0 %vm172_vm2, %v665_v13 }
 0x3f3   :  { %v3156_v14 = vpop.eup %3155  ;;  %2886 = vmatprep.mubr.msk.bf16.mxu0 %vm3248_vm0, %v3247_v0 }
 0x3f4   :  { %v654_v15 = vmul.f32 %v3156_v14, %v3460_v45 }
 0x3f6   :  { %v662_v17 = vpack.c.bf16 %v654_v15, %v654_v15 }
 0x3f7   :  { %v3158_v18 = vpop.eup %3157 }
 0x3f8   :  { %2853 = vmatmul.mubr.msk.bf16.vlgmr.msra.gmra.mxu1 %vm172_vm2, %v662_v17  ;;  %v656_v22 = vmul.f32 %v3158_v18, %v3464_v40 }
 0x3f9   :  { %2863 = vmatpush3.bf16.msra.mxu1 %v961_v19  ;;  %2864 = vmatprep.mubr.msk.bf16.mxu1 %vm3248_vm0, %v3247_v0 }
 0x3fa   :  { %2874 = vmatprep.subr.bf16.mxu1 %v3247_v0  ;;  %v664_v23 = vpack.c.bf16 %v656_v22, %v656_v22 }
 0x400   :  { %2865 = vmatmul.mubr.msk.bf16.vlgmr.msra.gmra.mxu1 %vm172_vm2, %v664_v23 }
 0x401   :  { %2878 = vmatprep.mubr.msk.bf16.mxu1 %vm3248_vm0, %v3247_v0  ;;  %2875 = vmatpush3.bf16.msra.mxu1 %v1106_v47  ;;  %v30_v47 = vld [vmem:[%s3851_s2] sm:$0xff] }
 0x402   :  { %2876 = vmatprep.subr.bf16.mxu1 %v3247_v0 }
 0x42a   :  { %v757_v26 = vpop.f32.mrf.mxu0 }
 0x42b   :  { %v709_v29 = vpop.f32.mrf.mxu1 }
 0x42c   :  { %v2836_v24 = vpop.f32.mrf.mxu0 }
 0x42d   :  { %v2830_v25 = vpop.f32.mrf.mxu1 }
 0x42e   :  { %v760_v27 = vpop.f32.mrf.mxu0 }
 0x42f   :  { %v712_v30 = vpop.f32.mrf.mxu1 }
 0x430   :  { %v2837_v31 = vpop.f32.mrf.mxu0  ;;  %v3117_v30 = vld [vmem:[%s3852_s3 + $0x1c] ss:$12 sps:$4 sm:$0xff]  }
 0x431   :  { %v2831_v32 = vpop.f32.mrf.mxu1  ;;  %2883 = vmatpush3.bf16.msra.mxu0 %v3117_v30 }
 0x432   :  { %2884 = vmatprep.subr.bf16.mxu0 %v3247_v0 }
 0x482   :  { %v853_v36 = vpop.f32.mrf.mxu0 }
 0x483   :  { %v805_v37 = vpop.f32.mrf.mxu1 }
 0x484   :  { %v3053_v38 = vpack.i.bf16 %v853_v36, %v805_v37  ;;  %v2848_v39 = vpop.f32.mrf.mxu0 }
 0x485   :  { %v2842_v41 = vpop.f32.mrf.mxu1 }
 0x486   :  { %3054 = vrot.lane.b32.xlu0 %v3053_v38, %s3257_s19  ;;  %v856_v42 = vpop.f32.mrf.mxu0 }
 0x487   :  { %v808_v43 = vpop.f32.mrf.mxu1 }
 0x488   :  { %v2849_v44 = vpop.f32.mrf.mxu0 }
 0x489   :  { %v2843_v45 = vpop.f32.mrf.mxu1  ;;  %v2644_v44 = vld [vmem:[%s3854_s5 + $0x4] ss:$0 sm:$0xff] }
 0x48a   :  { %v949_v28 = vpop.f32.mrf.mxu0 }
 0x48c   :  { %v2860_v40 = vpop.f32.mrf.mxu0 }
 0x48e   :  { %v952_v33 = vpop.f32.mrf.mxu0 }
 0x490   :  { %v2861_v46 = vpop.f32.mrf.mxu0 }
 0x4b2   :  { %v1045_v48 = vpop.f32.mrf.mxu0 }
 0x4b4   :  { %v2872_v49 = vpop.f32.mrf.mxu0 }
 0x4b6   :  { %v1048_v50 = vpop.f32.mrf.mxu0 }
 0x4b8   :  { %v901_v51 = vpop.f32.mrf.mxu1  ;;  %v2873_v52 = vpop.f32.mrf.mxu0 }
 0x4b9   :  { %v3058_v53 = vpack.i.bf16 %v949_v28, %v901_v51 }
 0x4ba   :  { %v2854_v54 = vpop.f32.mrf.mxu1 }
 0x4bb   :  { %3059 = vrot.lane.b32.xlu1 %v3058_v53, %s3258_s20  ;;  %v2642_v54 = vld [vmem:[%s3854_s5 + $0x2] ss:$0 sm:$0xff] }
 0x4bc   :  { %v904_v56 = vpop.f32.mrf.mxu1 }
 0x4be   :  { %v2855_v57 = vpop.f32.mrf.mxu1 }
 0x4bf   :  { %1103 = vrot.lane.b32.xlu1 %v3116_v55, %s3256_s18 }
 0x4c0   :  { %v997_v58 = vpop.f32.mrf.mxu1 }
 0x4c1   :  { %v3063_v59 = vpack.i.bf16 %v1045_v48, %v997_v58  ;;  %v31_v48 = vld [vmem:[%s3851_s2 + $0x8] sm:$0xff]  ;;  %v2643_v58 = vld [vmem:[%s3854_s5 + $0x3] ss:$0 sm:$0xff] }
 0x4c2   :  { %v2866_v60 = vpop.f32.mrf.mxu1  ;;  %v1262_v51 = vpack.c.bf16 %v31_v48, %v30_v47 }
 0x4c3   :  { %3064 = vrot.lane.b32.xlu0 %v3063_v59, %s3259_s23 }
 0x4c4   :  { %v1000_v61 = vpop.f32.mrf.mxu1 }
 0x4c6   :  { %v2867_v62 = vpop.f32.mrf.mxu1 }
 0x4f8   :  { %v3055_v1 = vpop.permute.xlu0 %3054 }
 0x4f9   :  { %v3057_v34 = vunpack.i.h.bf16 %v3055_v1  ;;  %v3056_v5 = vunpack.i.l.bf16 %v3055_v1 }
 0x4fb   :  { %v1076_v10 = vsel %vm172_vm2, %v757_v26, %v3057_v34  ;;  %v1075_v11 = vsel %vm172_vm2, %v709_v29, %v3056_v5 }
 0x52d   :  { %v3060_v63 = vpop.permute.xlu1 %3059 }
 0x52e   :  { %v3062_v6 = vunpack.i.h.bf16 %v3060_v63  ;;  %v3061_v7 = vunpack.i.l.bf16 %v3060_v63 }
 0x530   :  { %v1079_v12 = vsel %vm1077_vm5, %v1076_v10, %v3062_v6  ;;  %v1078_v8 = vsel %vm1077_vm5, %v1075_v11, %v3061_v7 }
 0x531   :  { %v1104_v2 = vpop.permute.xlu1 %1103 }
 0x532   :  { %2877 = vmatpush3.bf16.msra.mxu1 %v1104_v2 }
 0x533   :  { %2890 = vmatprep.subr.bf16.mxu1 %v3247_v0 }
 0x535   :  { %v3065_v9 = vpop.permute.xlu0 %3064 }
 0x536   :  { %v3067_v20 = vunpack.i.h.bf16 %v3065_v9  ;;  %v3066_v21 = vunpack.i.l.bf16 %v3065_v9 }
 0x538   :  { %v1082_v13 = vsel %vm1080_vm6, %v1079_v12, %v3067_v20  ;;  %v1081_v14 = vsel %vm1080_vm6, %v1078_v8, %v3066_v21 }
 0x539   :  { %v1087_v15 = vpack.c.bf16 %v1082_v13, %v1081_v14 }
 0x53b   :  { %2879 = vmatmul.mubr.msk.bf16.vlgmr.msra.gmra.mxu1 %vm96_vm1, %v1087_v15 }
 0x53c   :  { %2894 = vmatprep.mubr.msk.bf16.mxu1 %vm3248_vm0, %v3247_v0 }
 0x5fb   :  { %v1146_v17 = vpop.f32.mrf.mxu1 }
 0x5fc   :  { %v1147_v18 = vadd.f32 %v2638_v16, %v1146_v17 }
 0x5fd   :  { %v2880_v19 = vpop.f32.mrf.mxu1 }
 0x5fe   :  { %v1153_v22 = vadd.f32 %v1147_v18, %v3315_v3  ;;  %v3118_v3 = vld [vmem:[%s3852_s3 + $0x4] ss:$12 sps:$4 sm:$0xff]  }
 0x5ff   :  { %v1149_v23 = vpop.f32.mrf.mxu1  ;;  %2885 = vmatpush3.bf16.msra.mxu0 %v3118_v3 }
 0x600   :  { %v1150_v26 = vadd.f32 %v2638_v16, %v1149_v23  ;;  %v1157_v29 = vsel %vm96_vm1, %v1153_v22, 0.0  ;;  %2898 = vmatprep.subr.bf16.mxu0 %v3247_v0 }
 0x601   :  { %1158 = vadd.xlane.f32.xlu0 %v1157_v29  ;;  %v2881_v24 = vpop.f32.mrf.mxu1 }
 0x602   :  { %v1154_v25 = vadd.f32 %v1150_v26, %v3323_v4 }
 0x604   :  { %v1160_v27 = vsel %vm96_vm1, %v1154_v25, 0.0 }
 0x605   :  { %1161 = vadd.xlane.f32.xlu1 %v1160_v27 }
 0x616   :  { %1265 = vrot.lane.b32.xlu1 %v3117_v30, %s3251_s12 }
 0x61a   :  { %1270 = vrot.lane.b32.xlu1 %v2644_v44, %s3251_s12 }
 0x68a   :  { %v1159_v4 = vpop.xlane.xlu0 %1158 }
 0x68b   :  { %v1164_v31 = vmul.f32 0.03125, %v1159_v4 }
 0x68d   :  { %v1166_v32 = vsub.f32 %v1153_v22, %v1164_v31 }
 0x68e   :  { %v1162_v35 = vpop.xlane.xlu1 %1161 }
 0x68f   :  { %v1165_v36 = vmul.f32 0.03125, %v1162_v35  ;;  %v1168_v37 = vmul.f32 %v1166_v32, %v1166_v32 }
 0x691   :  { %v1167_v38 = vsub.f32 %v1154_v25, %v1165_v36  ;;  %v1170_v39 = vsel %vm96_vm1, %v1168_v37, 0.0 }
 0x692   :  { %1171 = vadd.xlane.f32.xlu0 %v1170_v39  ;;  %v1266_v43 = vpop.permute.xlu1 %1265 }
 0x693   :  { %v1169_v41 = vmul.f32 %v1167_v38, %v1167_v38  ;;  %2891 = vmatpush3.bf16.msra.mxu1 %v1266_v43 }
 0x694   :  { %2892 = vmatprep.subr.bf16.mxu1 %v3247_v0 }
 0x695   :  { %v1173_v42 = vsel %vm96_vm1, %v1169_v41, 0.0 }
 0x696   :  { %1174 = vadd.xlane.f32.xlu0 %v1173_v42  ;;  %v1271_v63 = vpop.permute.xlu1 %1270 }
 0x6ac   :  { %1263 = vrot.lane.b32.xlu0 %v3118_v3, %s3251_s12 }
 0x71b   :  { %v1172_v45 = vpop.xlane.xlu0 %1171 }
 0x71c   :  { %v1176_v28 = vmul.f32 0.03125, %v1172_v45 }
 0x71e   :  { %v1178_v40 = vadd.f32 1e-05, %v1176_v28 }
 0x71f   :  { %v1175_v33 = vpop.xlane.xlu0 %1174 }
 0x720   :  { %3159 = vrsqrt.f32 %v1178_v40  ;;  %v1177_v46 = vmul.f32 0.03125, %v1175_v33 }
 0x722   :  { %v1179_v49 = vadd.f32 1e-05, %v1177_v46 }
 0x723   :  { %v1264_v50 = vpop.permute.xlu0 %1263 }
 0x724   :  { %3161 = vrsqrt.f32 %v1179_v49  ;;  %2893 = vmatpush3.bf16.msra.mxu1 %v1264_v50 }
 0x725   :  { %2904 = vmatprep.subr.bf16.mxu1 %v3247_v0 }
 0x727   :  { %2895 = vmatmul.mubr.msk.bf16.vlgmr.msra.gmra.mxu1 %vm96_vm1, %v1262_v51 }
 0x728   :  { %2906 = vmatprep.mubr.msk.bf16.mxu1 %vm3248_vm0, %v3247_v0 }
 0x72d   :  { %v3160_v52 = vpop.eup %3159 }
 0x72e   :  { %v1182_v53 = vmul.f32 %v3160_v52, %v1166_v32 }
 0x730   :  { %v1188_v57 = vmul.f32 %v2642_v54, %v1182_v53 }
 0x731   :  { %v3162_v55 = vpop.eup %3161 }
 0x732   :  { %v1183_v56 = vmul.f32 %v3162_v55, %v1167_v38  ;;  %v3573_v60 = vadd.f32 %v2643_v58, %v1188_v57 }
 0x734   :  { %v1189_v59 = vmul.f32 %v2642_v54, %v1183_v56 }
 0x736   :  { %v3575_v61 = vadd.f32 %v2643_v58, %v1189_v59 }
 0x738   :  { %v1200_v62 = vpack.c.bf16 %v3575_v61, %v3573_v60 }
 0x73a   :  { %2887 = vmatmul.mubr.msk.bf16.vlgmr.msra.gmra.mxu0 %vm96_vm1, %v1200_v62 }
 0x73b   :  { %2900 = vmatprep.mubr.msk.bf16.mxu0 %vm3248_vm0, %v3247_v0 }
 0x7e7   :  { %v1310_v1 = vpop.f32.mrf.mxu1 }
 0x7e8   :  { %v1311_v2 = vadd.f32 %v1310_v1, %v1271_v63 }
 0x7e9   :  { %v2896_v34 = vpop.f32.mrf.mxu1 }
 0x7ea   :  { %v1365_v5 = vpack.c.bf16 %v1311_v2, %v1311_v2 }
 0x7eb   :  { %v1313_v6 = vpop.f32.mrf.mxu1 }
 0x7ec   :  { %v1314_v7 = vadd.f32 %v1313_v6, %v1271_v63  ;;  %v1377_v9 = vsel %vm172_vm2, %v1365_v5, 0 }
 0x7ed   :  { %v2897_v10 = vpop.f32.mrf.mxu1  ;;  %2899 = vmatpush3.bf16.xpose.msra.mxu0 %v1377_v9 }
 0x7ee   :  { %v3068_v11 = vpack.i.bf16 %v1314_v7, %v1311_v2  ;;  %v1366_v20 = vpack.c.bf16 %v1314_v7, %v1314_v7  ;;  %2910 = vmatprep.subr.bf16.mxu0 %v3247_v0 }
 0x7f0   :  { %3069 = vrot.lane.b32.xlu1 %v3068_v11, %s3250_s11  ;;  %v1423_v21 = vsel %vm172_vm2, %v1366_v20, 0 }
 0x7f1   :  { %2905 = vmatpush3.bf16.xpose.msra.mxu1 %v1423_v21 }
 0x7f2   :  { %2916 = vmatprep.subr.bf16.mxu1 %v3247_v0 }
 0x7f4   :  { %3079 = vrot.lane.b32.xlu1 %v3068_v11, %s3252_s13 }
 0x7f8   :  { %3089 = vrot.lane.b32.xlu1 %v3068_v11, %s3249_s1 }
 0x7fa   :  { %v1255_v12 = vpop.f32.mrf.mxu0 }
 0x7fb   :  { %v1256_v8 = vadd.f32 %v2644_v44, %v1255_v12 }
 0x7fc   :  { %v2888_v13 = vpop.f32.mrf.mxu0  ;;  %1887 = vrot.lane.b32.xlu1 %v1366_v20, %s3251_s12 }
 0x7fd   :  { %v1357_v14 = vpack.c.bf16 %v1256_v8, %v1256_v8 }
 0x7fe   :  { %v1258_v15 = vpop.f32.mrf.mxu0 }
 0x7ff   :  { %v1259_v16 = vadd.f32 %v2644_v44, %v1258_v15  ;;  %2901 = vmatmul.mubr.msk.bf16.vlgmr.msra.gmra.mxu0 %vm172_vm2, %v1357_v14 }
 0x800   :  { %v2889_v17 = vpop.f32.mrf.mxu0  ;;  %2912 = vmatprep.mubr.msk.bf16.mxu0 %vm3248_vm0, %v3247_v0 }
 0x801   :  { %v1358_v18 = vpack.c.bf16 %v1259_v16, %v1259_v16  ;;  %v3073_v19 = vpack.i.bf16 %v1259_v16, %v1256_v8 }
 0x803   :  { %3074 = vrot.lane.b32.xlu0 %v3073_v19, %s3250_s11  ;;  %2907 = vmatmul.mubr.msk.bf16.vlgmr.msra.gmra.mxu1 %vm172_vm2, %v1358_v18 }
 0x804   :  { %2918 = vmatprep.mubr.msk.bf16.mxu1 %vm3248_vm0, %v3247_v0 }
 0x807   :  { %3084 = vrot.lane.b32.xlu0 %v3073_v19, %s3252_s13 }
 0x80b   :  { %3094 = vrot.lane.b32.xlu0 %v3073_v19, %s3249_s1 }
 0x80f   :  { %1838 = vrot.lane.b32.xlu0 %v1365_v5, %s3251_s12 }
 0x862   :  { %v3070_v22 = vpop.permute.xlu1 %3069 }
 0x863   :  { %v3072_v23 = vunpack.i.h.bf16 %v3070_v22  ;;  %v3071_v26 = vunpack.i.l.bf16 %v3070_v22 }
 0x865   :  { %v3600_v29 = vpack.c.bf16 %v3072_v23, %v3072_v23  ;;  %v3602_v24 = vpack.c.bf16 %v3071_v26, %v3071_v26 }
 0x866   :  { %v3080_v30 = vpop.permute.xlu1 %3079 }
 0x867   :  { %v1469_v25 = vsel %vm172_vm2, %v3602_v24, 0  ;;  %v1515_v27 = vsel %vm172_vm2, %v3600_v29, 0  ;;  %v3082_v3 = vunpack.i.h.bf16 %v3080_v30  ;;  %v3081_v4 = vunpack.i.l.bf16 %v3080_v30 }
 0x868   :  { %2911 = vmatpush3.bf16.xpose.msra.mxu0 %v1469_v25  ;;  %2917 = vmatpush3.bf16.xpose.msra.mxu1 %v1515_v27 }
 0x869   :  { %2922 = vmatprep.subr.bf16.mxu0 %v3247_v0  ;;  %2928 = vmatprep.subr.bf16.mxu1 %v3247_v0  ;;  %v3610_v32 = vpack.c.bf16 %v3082_v3, %v3082_v3  ;;  %v3612_v35 = vpack.c.bf16 %v3081_v4, %v3081_v4 }
 0x86a   :  { %v3090_v38 = vpop.permute.xlu1 %3089 }
 0x86b   :  { %v3092_v43 = vunpack.i.h.bf16 %v3090_v38  ;;  %v3091_v44 = vunpack.i.l.bf16 %v3090_v38  ;;  %v1561_v45 = vsel %vm172_vm2, %v3612_v35, 0  ;;  %v1607_v28 = vsel %vm172_vm2, %v3610_v32, 0 }
 0x86d   :  { %v3626_v46 = vpack.c.bf16 %v3092_v43, %v3092_v43  ;;  %v3628_v47 = vpack.c.bf16 %v3091_v44, %v3091_v44 }
 0x86e   :  { %v1888_v55 = vpop.permute.xlu1 %1887 }
 0x86f   :  { %v1653_v51 = vsel %vm172_vm2, %v3628_v47, 0  ;;  %v1699_v52 = vsel %vm172_vm2, %v3626_v46, 0  ;;  %v1893_v59 = vsel %vm671_vm3, %v1888_v55, 0 }
 0x875   :  { %v3075_v31 = vpop.permute.xlu0 %3074 }
 0x876   :  { %v3077_v36 = vunpack.i.h.bf16 %v3075_v31  ;;  %v3076_v37 = vunpack.i.l.bf16 %v3075_v31 }
 0x878   :  { %v1360_v39 = vpack.c.bf16 %v3077_v36, %v3077_v36  ;;  %v1359_v41 = vpack.c.bf16 %v3076_v37, %v3076_v37 }
 0x879   :  { %v3085_v42 = vpop.permute.xlu0 %3084 }
 0x87a   :  { %2913 = vmatmul.mubr.msk.bf16.vlgmr.msra.gmra.mxu0 %vm172_vm2, %v1359_v41  ;;  %2919 = vmatmul.mubr.msk.bf16.vlgmr.msra.gmra.mxu1 %vm172_vm2, %v1360_v39  ;;  %v3087_v40 = vunpack.i.h.bf16 %v3085_v42  ;;  %v3086_v33 = vunpack.i.l.bf16 %v3085_v42 }
 0x87b   :  { %2923 = vmatpush3.bf16.xpose.msra.mxu0 %v1561_v45  ;;  %2929 = vmatpush3.bf16.xpose.msra.mxu1 %v1607_v28 }
 0x87c   :  { %2924 = vmatprep.mubr.msk.bf16.mxu0 %vm3248_vm0, %v3247_v0  ;;  %2930 = vmatprep.mubr.msk.bf16.mxu1 %vm3248_vm0, %v3247_v0  ;;  %v1362_v48 = vpack.c.bf16 %v3087_v40, %v3087_v40  ;;  %v1361_v49 = vpack.c.bf16 %v3086_v33, %v3086_v33 }
 0x87d   :  { %2934 = vmatprep.subr.bf16.mxu0 %v3247_v0  ;;  %2940 = vmatprep.subr.bf16.mxu1 %v3247_v0  ;;  %v3095_v50 = vpop.permute.xlu0 %3094 }
 0x87e   :  { %v3097_v53 = vunpack.i.h.bf16 %v3095_v50  ;;  %v3096_v54 = vunpack.i.l.bf16 %v3095_v50 }
 0x880   :  { %v1364_v57 = vpack.c.bf16 %v3097_v53, %v3097_v53  ;;  %v1363_v58 = vpack.c.bf16 %v3096_v54, %v3096_v54 }
 0x881   :  { %v1839_v56 = vpop.permute.xlu0 %1838 }
 0x882   :  { %2925 = vmatmul.mubr.msk.bf16.vlgmr.msra.gmra.mxu0 %vm172_vm2, %v1361_v49  ;;  %2931 = vmatmul.mubr.msk.bf16.vlgmr.msra.gmra.mxu1 %vm172_vm2, %v1362_v48  ;;  %v1844_v62 = vsel %vm671_vm3, %v1839_v56, 0 }
 0x883   :  { %2935 = vmatpush3.bf16.xpose.msra.mxu0 %v1653_v51  ;;  %2941 = vmatpush3.bf16.xpose.msra.mxu1 %v1699_v52 }
 0x884   :  { %2936 = vmatprep.mubr.msk.bf16.mxu0 %vm3248_vm0, %v3247_v0  ;;  %2942 = vmatprep.mubr.msk.bf16.mxu1 %vm3248_vm0, %v3247_v0 }
 0x885   :  { %2946 = vmatprep.subr.bf16.mxu0 %v3247_v0  ;;  %2952 = vmatprep.subr.bf16.mxu1 %v3247_v0 }
 0x88a   :  { %2937 = vmatmul.mubr.msk.bf16.vlgmr.msra.gmra.mxu0 %vm172_vm2, %v1363_v58  ;;  %2943 = vmatmul.mubr.msk.bf16.vlgmr.msra.gmra.mxu1 %vm172_vm2, %v1364_v57 }
 0x88b   :  { %2947 = vmatpush3.bf16.msra.mxu0 %v1844_v62  ;;  %2953 = vmatpush3.bf16.msra.mxu1 %v1893_v59 }
 0x88c   :  { %2948 = vmatprep.mubr.msk.bf16.mxu0 %vm3248_vm0, %v3247_v0  ;;  %2954 = vmatprep.mubr.msk.bf16.mxu1 %vm3248_vm0, %v3247_v0 }
 0x88d   :  { %2958 = vmatprep.subr.bf16.mxu0 %v3247_v0  ;;  %2964 = vmatprep.subr.bf16.mxu1 %v3247_v0 }
 0x8bf   :  { %v1413_v63 = vpop.f32.mrf.mxu0 }
 0x8c0   :  { %v1741_v1 = vsel %vm172_vm2, %v1413_v63, -inf }
 0x8c1   :  { %v2902_v2 = vpop.f32.mrf.mxu0  ;;  %1742 = vmax.xlane.f32.xlu1 %v1741_v1 }
 0x8c3   :  { %v1416_v34 = vpop.f32.mrf.mxu0  ;;  %v1459_v5 = vpop.f32.mrf.mxu1 }
 0x8c4   :  { %v1744_v6 = vsel %vm172_vm2, %v1459_v5, -inf }
 0x8c5   :  { %v2903_v7 = vpop.f32.mrf.mxu0  ;;  %1745 = vmax.xlane.f32.xlu0 %v1744_v6  ;;  %v2908_v9 = vpop.f32.mrf.mxu1 }
 0x8c7   :  { %v1462_v10 = vpop.f32.mrf.mxu1 }
 0x8c9   :  { %v2909_v11 = vpop.f32.mrf.mxu1 }
 0x93a   :  { %v1505_v20 = vpop.f32.mrf.mxu0  ;;  %v1551_v21 = vpop.f32.mrf.mxu1 }
 0x93b   :  { %v1747_v12 = vsel %vm172_vm2, %v1505_v20, -inf  ;;  %v1750_v8 = vsel %vm172_vm2, %v1551_v21, -inf }
 0x93c   :  { %v2914_v13 = vpop.f32.mrf.mxu0  ;;  %1748 = vmax.xlane.f32.xlu0 %v1747_v12  ;;  %1751 = vmax.xlane.f32.xlu1 %v1750_v8  ;;  %v2920_v14 = vpop.f32.mrf.mxu1 }
 0x93e   :  { %v1508_v15 = vpop.f32.mrf.mxu0  ;;  %v1554_v16 = vpop.f32.mrf.mxu1 }
 0x940   :  { %v2915_v17 = vpop.f32.mrf.mxu0  ;;  %v2921_v18 = vpop.f32.mrf.mxu1 }
 0x942   :  { %v3656_v19 = vpop.f32.mrf.mxu0  ;;  %v1643_v22 = vpop.f32.mrf.mxu1 }
 0x943   :  { %v1753_v23 = vsel %vm172_vm2, %v3656_v19, -inf  ;;  %v1756_v26 = vsel %vm172_vm2, %v1643_v22, -inf }
 0x944   :  { %v2926_v25 = vpop.f32.mrf.mxu0  ;;  %1754 = vmax.xlane.f32.xlu0 %v1753_v23  ;;  %1757 = vmax.xlane.f32.xlu1 %v1756_v26  ;;  %v2932_v27 = vpop.f32.mrf.mxu1 }
 0x946   :  { %v1600_v30 = vpop.f32.mrf.mxu0  ;;  %v1646_v3 = vpop.f32.mrf.mxu1 }
 0x948   :  { %v2927_v4 = vpop.f32.mrf.mxu0  ;;  %v2933_v31 = vpop.f32.mrf.mxu1 }
 0x94a   :  { %v3661_v36 = vpop.f32.mrf.mxu0  ;;  %v1735_v37 = vpop.f32.mrf.mxu1 }
 0x94b   :  { %v1759_v38 = vsel %vm172_vm2, %v3661_v36, -inf  ;;  %v1762_v41 = vsel %vm172_vm2, %v1735_v37, -inf  ;;  %v1743_v40 = vpop.xlane.xlu1 %1742 }
 0x94c   :  { %v2938_v39 = vpop.f32.mrf.mxu0  ;;  %1760 = vmax.xlane.f32.xlu0 %v1759_v38  ;;  %1763 = vmax.xlane.f32.xlu1 %v1762_v41  ;;  %v2944_v42 = vpop.f32.mrf.mxu1  ;;  %v1765_v48 = vsub.f32 %v1413_v63, %v1743_v40 }
 0x94e   :  { %v1692_v43 = vpop.f32.mrf.mxu0  ;;  %v1738_v44 = vpop.f32.mrf.mxu1  ;;  %v1773_v50 = vmul.f32 1.442695, %v1765_v48 }
 0x94f   :  { %v1746_v33 = vpop.xlane.xlu0 %1745 }
 0x950   :  { %v2939_v45 = vpop.f32.mrf.mxu0  ;;  %v2945_v28 = vpop.f32.mrf.mxu1  ;;  %v1766_v49 = vsub.f32 %v1459_v5, %v1746_v33  ;;  %3163 = vpow2.f32 %v1773_v50 }
 0x952   :  { %v1775_v51 = vmul.f32 1.442695, %v1766_v49 }
 0x954   :  { %3165 = vpow2.f32 %v1775_v51 }
 0x95d   :  { %1936 = vrot.lane.b32.xlu1 %v3602_v24, %s3251_s12  ;;  %v3164_v52 = vpop.eup %3163 }
 0x95e   :  { %v1789_v54 = vsel %vm172_vm2, %v3164_v52, 0.0 }
 0x961   :  { %v3166_v53 = vpop.eup %3165 }
 0x962   :  { %1985 = vrot.lane.b32.xlu0 %v3600_v29, %s3251_s12  ;;  %v1792_v55 = vsel %vm172_vm2, %v3166_v53, 0.0 }
 0x981   :  { %1790 = vadd.xlane.f32.xlu0 %v1789_v54  ;;  %1793 = vadd.xlane.f32.xlu1 %v1792_v55 }
 0x992   :  { %2034 = vrot.lane.b32.xlu1 %v3612_v35, %s3251_s12 }
 0x9c5   :  { %v1749_v29 = vpop.xlane.xlu0 %1748  ;;  %v1752_v24 = vpop.xlane.xlu1 %1751 }
 0x9c6   :  { %v1767_v56 = vsub.f32 %v1505_v20, %v1749_v29  ;;  %v1768_v57 = vsub.f32 %v1551_v21, %v1752_v24 }
 0x9c8   :  { %v1777_v58 = vmul.f32 1.442695, %v1767_v56  ;;  %v1779_v59 = vmul.f32 1.442695, %v1768_v57 }
 0x9ca   :  { %3167 = vpow2.f32 %v1777_v58 }
 0x9cb   :  { %3169 = vpow2.f32 %v1779_v59 }
 0x9cd   :  { %v1758_v62 = vpop.xlane.xlu1 %1757  ;;  %v1755_v12 = vpop.xlane.xlu0 %1754 }
 0x9ce   :  { %v1770_v63 = vsub.f32 %v1643_v22, %v1758_v62  ;;  %v1769_v8 = vsub.f32 %v3656_v19, %v1755_v12 }
 0x9d0   :  { %v1783_v1 = vmul.f32 1.442695, %v1770_v63  ;;  %v1781_v14 = vmul.f32 1.442695, %v1769_v8 }
 0x9d2   :  { %3171 = vpow2.f32 %v1783_v1 }
 0x9d5   :  { %v1764_v2 = vpop.xlane.xlu1 %1763  ;;  %v1761_v13 = vpop.xlane.xlu0 %1760 }
 0x9d6   :  { %v1772_v5 = vsub.f32 %v1735_v37, %v1764_v2  ;;  %v1771_v15 = vsub.f32 %v3661_v36, %v1761_v13 }
 0x9d7   :  { %v3674_v34 = vpop.eup %3167 }
 0x9d8   :  { %v3170_v6 = vpop.eup %3169  ;;  %v1795_v35 = vsel %vm172_vm2, %v3674_v34, 0.0  ;;  %v1787_v7 = vmul.f32 1.442695, %v1772_v5  ;;  %v1785_v16 = vmul.f32 1.442695, %v1771_v15 }
 0x9d9   :  { %1796 = vadd.xlane.f32.xlu0 %v1795_v35  ;;  %v1798_v9 = vsel %vm172_vm2, %v3170_v6, 0.0  ;;  %v1986_v17 = vpop.permute.xlu0 %1985  ;;  %v1937_v18 = vpop.permute.xlu1 %1936 }
 0x9da   :  { %1799 = vadd.xlane.f32.xlu1 %v1798_v9  ;;  %3173 = vpow2.f32 %v1787_v7  ;;  %v1942_v36 = vsel %vm671_vm3, %v1937_v18, 0  ;;  %v1991_v37 = vsel %vm671_vm3, %v1986_v17, 0 }
 0x9db   :  { %3175 = vpow2.f32 %v1781_v14 }
 0x9dc   :  { %3177 = vpow2.f32 %v1785_v16 }
 0x9df   :  { %v3679_v10 = vpop.eup %3171 }
 0x9e0   :  { %v1804_v11 = vsel %vm172_vm2, %v3679_v10, 0.0 }
 0x9e1   :  { %1805 = vadd.xlane.f32.xlu1 %v1804_v11 }
 0x9e7   :  { %v3683_v20 = vpop.eup %3173 }
 0x9e8   :  { %v1810_v21 = vsel %vm172_vm2, %v3683_v20, 0.0  ;;  %v3693_v22 = vpop.eup %3175 }
 0x9e9   :  { %1811 = vadd.xlane.f32.xlu1 %v1810_v21  ;;  %v1801_v19 = vsel %vm172_vm2, %v3693_v22, 0.0  ;;  %v3697_v26 = vpop.eup %3177 }
 0x9ef   :  { %2083 = vrot.lane.b32.xlu0 %v3610_v32, %s3251_s12 }
 0x9fa   :  { %2132 = vrot.lane.b32.xlu1 %v3628_v47, %s3251_s12  ;;  %v1807_v47 = vsel %vm172_vm2, %v3697_v26, 0.0 }
 0xa0a   :  { %v1791_v23 = vpop.xlane.xlu0 %1790  ;;  %v1794_v32 = vpop.xlane.xlu1 %1793 }
 0xa0b   :  { %3179 = vrcp.f32 %v1791_v23 }
 0xa0c   :  { %3181 = vrcp.f32 %v1794_v32 }
 0xa0e   :  { %1802 = vadd.xlane.f32.xlu0 %v1801_v19  ;;  %v2035_v38 = vpop.permute.xlu1 %2034 }
 0xa0f   :  { %v2040_v50 = vsel %vm671_vm3, %v2035_v38, 0 }
 0xa12   :  { %1808 = vadd.xlane.f32.xlu0 %v1807_v47 }
 0xa18   :  { %v3180_v25 = vpop.eup %3179 }
 0xa19   :  { %v3182_v27 = vpop.eup %3181  ;;  %v3701_v30 = vmul.f32 %v3180_v25, %v3164_v52 }
 0xa1a   :  { %v1816_v3 = vmul.f32 %v3182_v27, %v3166_v53 }
 0xa1b   :  { %v1829_v4 = vpack.c.bf16 %v3701_v30, %v3701_v30 }
 0xa1c   :  { %v1830_v31 = vpack.c.bf16 %v1816_v3, %v1816_v3  ;;  %v2266_v55 = vsel %vm172_vm2, %v1816_v3, 0.0  ;;  %v3119_v3 = vld [vmem:[%s3852_s3 + $0x1c] ss:$12 sps:$4 sm:$0xff]  }
 0xa1d   :  { %2949 = vmatmul.mubr.msk.bf16.vlgmr.msra.gmra.mxu0 %vm172_vm2, %v1829_v4  ;;  %2298 = vrot.lane.b32.xlu1 %v3119_v3, %s3256_s18 }
 0xa1e   :  { %2955 = vmatmul.mubr.msk.bf16.vlgmr.msra.gmra.mxu1 %vm172_vm2, %v1830_v31  ;;  %2959 = vmatpush3.bf16.msra.mxu0 %v1942_v36 }
 0xa1f   :  { %2965 = vmatpush3.bf16.msra.mxu1 %v1991_v37  ;;  %2960 = vmatprep.mubr.msk.bf16.mxu0 %vm3248_vm0, %v3247_v0 }
 0xa20   :  { %2966 = vmatprep.mubr.msk.bf16.mxu1 %vm3248_vm0, %v3247_v0  ;;  %2970 = vmatprep.subr.bf16.mxu0 %v3247_v0 }
 0xa21   :  { %2976 = vmatprep.subr.bf16.mxu1 %v3247_v0 }
 0xa28   :  { %2181 = vrot.lane.b32.xlu0 %v3626_v46, %s3251_s12 }
 0xa62   :  { %v1797_v39 = vpop.xlane.xlu0 %1796 }
 0xa63   :  { %3183 = vrcp.f32 %v1797_v39  ;;  %v1800_v41 = vpop.xlane.xlu1 %1799 }
 0xa64   :  { %3185 = vrcp.f32 %v1800_v41 }
 0xa66   :  { %v2084_v40 = vpop.permute.xlu0 %2083 }
 0xa67   :  { %v2089_v46 = vsel %vm671_vm3, %v2084_v40, 0 }
 0xa6a   :  { %v1806_v42 = vpop.xlane.xlu1 %1805 }
 0xa6b   :  { %3187 = vrcp.f32 %v1806_v42 }
 0xa70   :  { %v3184_v43 = vpop.eup %3183 }
 0xa71   :  { %v3186_v44 = vpop.eup %3185  ;;  %v1818_v45 = vmul.f32 %v3184_v43, %v3674_v34 }
 0xa72   :  { %v1820_v28 = vmul.f32 %v3186_v44, %v3170_v6  ;;  %v1812_v33 = vpop.xlane.xlu1 %1811 }
 0xa73   :  { %v1831_v48 = vpack.c.bf16 %v1818_v45, %v1818_v45  ;;  %3189 = vrcp.f32 %v1812_v33  ;;  %v2260_v9 = vsel %vm172_vm2, %v1818_v45, 0.0 }
 0xa74   :  { %v1832_v49 = vpack.c.bf16 %v1820_v28, %v1820_v28  ;;  %v2267_v54 = vsel %vm172_vm2, %v1820_v28, 0.0 }
 0xa75   :  { %2961 = vmatmul.mubr.msk.bf16.vlgmr.msra.gmra.mxu0 %vm172_vm2, %v1831_v48  ;;  %v2268_v56 = vadd.f32 %v2267_v54, %v2266_v55  ;;  %v3120_v54 = vld [vmem:[%s3852_s3 + $0x4] ss:$12 sps:$4 sm:$0xff]  }
 0xa76   :  { %2967 = vmatmul.mubr.msk.bf16.vlgmr.msra.gmra.mxu1 %vm172_vm2, %v1832_v49  ;;  %2971 = vmatpush3.bf16.msra.mxu0 %v2040_v50 }
 0xa77   :  { %2977 = vmatpush3.bf16.msra.mxu1 %v2089_v46  ;;  %2978 = vmatprep.mubr.msk.bf16.mxu1 %vm3248_vm0, %v3247_v0 }
 0xa78   :  { %2988 = vmatprep.subr.bf16.mxu1 %v3247_v0  ;;  %2972 = vmatprep.mubr.msk.bf16.mxu0 %vm3248_vm0, %v3247_v0  ;;  %v3188_v51 = vpop.eup %3187 }
 0xa79   :  { %2982 = vmatprep.subr.bf16.mxu0 %v3247_v0  ;;  %v1824_v52 = vmul.f32 %v3188_v51, %v3679_v10  ;;  %v2133_v10 = vpop.permute.xlu1 %2132 }
 0xa7a   :  { %v2138_v13 = vsel %vm671_vm3, %v2133_v10, 0 }
 0xa7b   :  { %v1834_v53 = vpack.c.bf16 %v1824_v52, %v1824_v52  ;;  %v2269_v29 = vsel %vm172_vm2, %v1824_v52, 0.0 }
 0xa7c   :  { %v2270_v58 = vadd.f32 %v2269_v29, %v2268_v56 }
 0xa7e   :  { %2979 = vmatmul.mubr.msk.bf16.vlgmr.msra.gmra.mxu1 %vm172_vm2, %v1834_v53 }
 0xa7f   :  { %2990 = vmatprep.mubr.msk.bf16.mxu1 %vm3248_vm0, %v3247_v0 }
 0xa80   :  { %v3190_v24 = vpop.eup %3189 }
 0xa81   :  { %v1828_v57 = vmul.f32 %v3190_v24, %v3683_v20  ;;  %v2259_v20 = vsel %vm172_vm2, %v3701_v30, 0.0 }
 0xa82   :  { %v2261_v8 = vadd.f32 %v2260_v9, %v2259_v20 }
 0xa83   :  { %v2271_v59 = vsel %vm172_vm2, %v1828_v57, 0.0  ;;  %v1836_v6 = vpack.c.bf16 %v1828_v57, %v1828_v57 }
 0xa84   :  { %v2272_v62 = vadd.f32 %v2271_v59, %v2270_v58 }
 0xa86   :  { %v2275_v63 = vmul.f32 0.25, %v2272_v62 }
 0xa88   :  { %2584 = vst.msk [vmem:[#allocation4 + $0x8] sm:$0xff] %vm172_vm2, %v2275_v63 }
 0xa8f   :  { %v2299_v33 = vpop.permute.xlu1 %2298 }
 0xa97   :  { %v1803_v1 = vpop.xlane.xlu0 %1802 }
 0xa98   :  { %3191 = vrcp.f32 %v1803_v1 }
 0xa9b   :  { %v1809_v2 = vpop.xlane.xlu0 %1808 }
 0xa9c   :  { %3193 = vrcp.f32 %v1809_v2 }
 0xa9f   :  { %v2182_v34 = vpop.permute.xlu0 %2181 }
 0xaa0   :  { %v2187_v5 = vsel %vm671_vm3, %v2182_v34, 0 }
 0xaa1   :  { %2989 = vmatpush3.bf16.msra.mxu1 %v2187_v5 }
 0xaa2   :  { %3002 = vmatprep.subr.bf16.mxu1 %v3247_v0 }
 0xaa4   :  { %2991 = vmatmul.mubr.msk.bf16.vlgmr.msra.gmra.mxu1 %vm172_vm2, %v1836_v6 }
 0xaa5   :  { %v3192_v35 = vpop.eup %3191  ;;  %3006 = vmatprep.mubr.msk.bf16.mxu1 %vm3248_vm0, %v3247_v0 }
 0xaa6   :  { %v1822_v7 = vmul.f32 %v3192_v35, %v3693_v22 }
 0xaa8   :  { %v1833_v11 = vpack.c.bf16 %v1822_v7, %v1822_v7  ;;  %v2262_v21 = vsel %vm172_vm2, %v1822_v7, 0.0 }
 0xaa9   :  { %v3194_v12 = vpop.eup %3193  ;;  %v2263_v15 = vadd.f32 %v2262_v21, %v2261_v8 }
 0xaaa   :  { %2973 = vmatmul.mubr.msk.bf16.vlgmr.msra.gmra.mxu0 %vm172_vm2, %v1833_v11  ;;  %v1826_v14 = vmul.f32 %v3194_v12, %v3697_v26 }
 0xaab   :  { %2983 = vmatpush3.bf16.msra.mxu0 %v2138_v13  ;;  %2984 = vmatprep.mubr.msk.bf16.mxu0 %vm3248_vm0, %v3247_v0 }
 0xaac   :  { %2994 = vmatprep.subr.bf16.mxu0 %v3247_v0  ;;  %v2264_v16 = vsel %vm172_vm2, %v1826_v14, 0.0  ;;  %v1835_v22 = vpack.c.bf16 %v1826_v14, %v1826_v14  ;;  %v2665_v14 = vld [vmem:[%s3854_s5 + $0x5] ss:$0 sm:$0xff] }
 0xaad   :  { %v2265_v17 = vadd.f32 %v2264_v16, %v2263_v15 }
 0xaaf   :  { %v2274_v18 = vmul.f32 0.25, %v2265_v17 }
 0xab1   :  { %2583 = vst.msk [vmem:[#allocation4] sm:$0xff] %vm172_vm2, %v2274_v18 }
 0xab2   :  { %2985 = vmatmul.mubr.msk.bf16.vlgmr.msra.gmra.mxu0 %vm172_vm2, %v1835_v22 }
 0xab3   :  { %2998 = vmatprep.mubr.msk.bf16.mxu0 %vm3248_vm0, %v3247_v0  ;;  %2995 = vmatpush3.bf16.msra.mxu0 %v2299_v33 }
 0xab4   :  { %2996 = vmatprep.subr.bf16.mxu0 %v3247_v0 }
 0xadd   :  { %v1880_v23 = vpop.f32.mrf.mxu0 }
 0xade   :  { %v1929_v32 = vpop.f32.mrf.mxu1 }
 0xadf   :  { %v2950_v19 = vpop.f32.mrf.mxu0 }
 0xae0   :  { %v2956_v26 = vpop.f32.mrf.mxu1 }
 0xae1   :  { %v1883_v47 = vpop.f32.mrf.mxu0 }
 0xae2   :  { %v1932_v25 = vpop.f32.mrf.mxu1 }
 0xae3   :  { %v2951_v27 = vpop.f32.mrf.mxu0 }
 0xae4   :  { %v2957_v30 = vpop.f32.mrf.mxu1 }
 0xb35   :  { %v1978_v4 = vpop.f32.mrf.mxu0 }
 0xb36   :  { %v2027_v31 = vpop.f32.mrf.mxu1 }
 0xb37   :  { %v3098_v36 = vpack.i.bf16 %v2027_v31, %v1978_v4  ;;  %v2962_v37 = vpop.f32.mrf.mxu0 }
 0xb38   :  { %v2968_v38 = vpop.f32.mrf.mxu1 }
 0xb39   :  { %3099 = vrot.lane.b32.xlu0 %v3098_v36, %s3257_s19  ;;  %v1981_v39 = vpop.f32.mrf.mxu0 }
 0xb3a   :  { %v2030_v41 = vpop.f32.mrf.mxu1  ;;  %v3122_v39 = vld [vmem:[%s3852_s3 + $0x8] ss:$12 sps:$4 sm:$0xff]  }
 0xb3b   :  { %v2963_v42 = vpop.f32.mrf.mxu0  ;;  %v3123_v41 = vld [vmem:[%s3853_s4 + $0x18] sm:$0xff]  }
 0xb3c   :  { %v2969_v43 = vpop.f32.mrf.mxu1 }
 0xb3e   :  { %v2125_v44 = vpop.f32.mrf.mxu1 }
 0xb40   :  { %v2980_v45 = vpop.f32.mrf.mxu1 }
 0xb42   :  { %v2128_v28 = vpop.f32.mrf.mxu1 }
 0xb44   :  { %v2981_v40 = vpop.f32.mrf.mxu1 }
 0xb64   :  { %v2223_v48 = vpop.f32.mrf.mxu1 }
 0xb66   :  { %v2992_v49 = vpop.f32.mrf.mxu1 }
 0xb67   :  { %v2669_v49 = vld [vmem:[%s3854_s5 + $0x6] ss:$0 sm:$0xff] }
 0xb68   :  { %v2226_v50 = vpop.f32.mrf.mxu1 }
 0xb6a   :  { %v2076_v46 = vpop.f32.mrf.mxu0  ;;  %v2993_v51 = vpop.f32.mrf.mxu1 }
 0xb6b   :  { %v3103_v52 = vpack.i.bf16 %v2125_v44, %v2076_v46 }
 0xb6c   :  { %v2974_v53 = vpop.f32.mrf.mxu0 }
 0xb6d   :  { %3104 = vrot.lane.b32.xlu1 %v3103_v52, %s3258_s20  ;;  %v2670_v52 = vld [vmem:[%s3854_s5 + $0x7] ss:$0 sm:$0xff] }
 0xb6e   :  { %v2079_v55 = vpop.f32.mrf.mxu0 }
 0xb70   :  { %v2975_v29 = vpop.f32.mrf.mxu0 }
 0xb71   :  { %2296 = vrot.lane.b32.xlu1 %v3120_v54, %s3256_s18 }
 0xb72   :  { %v2174_v24 = vpop.f32.mrf.mxu0 }
 0xb73   :  { %v3108_v56 = vpack.i.bf16 %v2223_v48, %v2174_v24  ;;  %v3124_v24 = vld [vmem:[%s3853_s4 + $0x10] sm:$0xff]  }
 0xb74   :  { %v2986_v57 = vpop.f32.mrf.mxu0 }
 0xb75   :  { %3109 = vrot.lane.b32.xlu0 %v3108_v56, %s3259_s23  ;;  %v3125_v56 = vld [vmem:[%s3853_s4 + $0x8] sm:$0xff]   ;;  %v3126_v57 = vld [vmem:[%s3853_s4] sm:$0xff]   ;;  %s3260_s4 = smov [#allocation4]  }
 0xb76   :  { %v2177_v58 = vpop.f32.mrf.mxu0  ;;  %s2602_s1 = sshll.u32 %s3260_s4, 4  ;;  %s2603_s1 = int_to_ptr.vmem [resolvable:$true] %s2602_s1 }
 0xb77   :  { %v2671_v58 = vld [vmem:[%s3854_s5 + $0x8] ss:$0 sm:$0xff]  ;;  %s3203_s11 = scalar_lea.vmem %s2603_s1, 256  ;;  %p3208_p1 = scmp.lt.s32.totalorder %s2603_s1, %s2603_s1 }
 0xb78   :  { %v2987_v59 = vpop.f32.mrf.mxu0  ;;  %p3204_p0 = scmp.ne.s32.totalorder %s2603_s1, %s3203_s11  ;;  %p3209_p2 = scmp.lt.s32.totalorder %s3203_s11, %s3203_s11 }
 0xb7a   :  { %p3210_p3 = por %p3209_p2, %p3208_p1 }
 0xb7c   :  { %p3211_p4 = pnand %p3210_p3, %p3204_p0 }
 0xbab   :  { %v3100_v63 = vpop.permute.xlu0 %3099 }
 0xbac   :  { %v3102_v2 = vunpack.i.h.bf16 %v3100_v63  ;;  %v3101_v34 = vunpack.i.l.bf16 %v3100_v63 }
 0xbae   :  { %v2254_v7 = vsel %vm172_vm2, %v1929_v32, %v3102_v2  ;;  %v2253_v9 = vsel %vm172_vm2, %v1880_v23, %v3101_v34 }
 0xbdf   :  { %v3105_v62 = vpop.permute.xlu1 %3104 }
 0xbe0   :  { %v3107_v5 = vunpack.i.h.bf16 %v3105_v62  ;;  %v3106_v6 = vunpack.i.l.bf16 %v3105_v62 }
 0xbe2   :  { %v2256_v20 = vsel %vm1077_vm5, %v2254_v7, %v3107_v5  ;;  %v2255_v21 = vsel %vm1077_vm5, %v2253_v9, %v3106_v6 }
 0xbe3   :  { %v2297_v1 = vpop.permute.xlu1 %2296 }
 0xbe4   :  { %2997 = vmatpush3.bf16.msra.mxu0 %v2297_v1 }
 0xbe5   :  { %3010 = vmatprep.subr.bf16.mxu0 %v3247_v0 }
 0xbe7   :  { %v3110_v35 = vpop.permute.xlu0 %3109 }
 0xbe8   :  { %v3112_v10 = vunpack.i.h.bf16 %v3110_v35  ;;  %v3111_v11 = vunpack.i.l.bf16 %v3110_v35 }
 0xbea   :  { %v2258_v12 = vsel %vm1080_vm6, %v2256_v20, %v3112_v10  ;;  %v2257_v8 = vsel %vm1080_vm6, %v2255_v21, %v3111_v11 }
 0xbeb   :  { %v2280_v13 = vpack.c.bf16 %v2258_v12, %v2257_v8 }
 0xbed   :  { %2999 = vmatmul.mubr.msk.bf16.vlgmr.msra.gmra.mxu0 %vm96_vm1, %v2280_v13 }
 0xbee   :  { %3018 = vmatprep.mubr.msk.bf16.mxu0 %vm3248_vm0, %v3247_v0  ;;  %3011 = vmatpush3.bf16.msra.mxu0 %v3123_v41 }
 0xbef   :  { %3012 = vmatprep.subr.bf16.mxu0 %v3247_v0 }
 0xbf2   :  { %3013 = vmatpush3.bf16.msra.mxu0 %v3124_v24 }
 0xbf3   :  { %3014 = vmatprep.subr.bf16.mxu0 %v3247_v0 }
 0xbf6   :  { %3015 = vmatpush3.bf16.msra.mxu0 %v3125_v56 }
 0xbf7   :  { %3016 = vmatprep.subr.bf16.mxu0 %v3247_v0 }
 0xbfa   :  { %3017 = vmatpush3.bf16.msra.mxu0 %v3126_v57 }
 0xcad   :  { %v2339_v15 = vpop.f32.mrf.mxu0 }
 0xcae   :  { %v2340_v16 = vadd.f32 %v2665_v14, %v2339_v15 }
 0xcaf   :  { %v3000_v17 = vpop.f32.mrf.mxu0 }
 0xcb0   :  { %v2346_v18 = vadd.f32 %v2340_v16, %v3573_v60 }
 0xcb1   :  { %v2342_v22 = vpop.f32.mrf.mxu0 }
 0xcb2   :  { %v2343_v23 = vadd.f32 %v2665_v14, %v2342_v22  ;;  %v2350_v32 = vsel %vm96_vm1, %v2346_v18, 0.0 }
 0xcb3   :  { %2351 = vadd.xlane.f32.xlu0 %v2350_v32  ;;  %v3001_v19 = vpop.f32.mrf.mxu0 }
 0xcb4   :  { %v2347_v26 = vadd.f32 %v2343_v23, %v3575_v61  ;;  %v3121_v61 = vld [vmem:[%s3852_s3 + $0x20] ss:$12 sps:$4 sm:$0xff]  }
 0xcb5   :  { %3003 = vmatpush3.bf16.msra.mxu1 %v3121_v61 }
 0xcb6   :  { %v2353_v47 = vsel %vm96_vm1, %v2347_v26, 0.0  ;;  %3004 = vmatprep.subr.bf16.mxu1 %v3247_v0  ;;  %v2675_v0 = vld [vmem:[%s3854_s5 + $0x9] ss:$0 sm:$0xff] }
 0xcb7   :  { %2354 = vadd.xlane.f32.xlu1 %v2353_v47 }
 0xcb9   :  { %3005 = vmatpush3.bf16.msra.mxu1 %v3122_v39 }
 0xd3c   :  { %v2352_v25 = vpop.xlane.xlu0 %2351 }
 0xd3d   :  { %v2356_v27 = vmul.f32 0.03125, %v2352_v25 }
 0xd3f   :  { %v2358_v30 = vsub.f32 %v2346_v18, %v2356_v27 }
 0xd40   :  { %v2355_v3 = vpop.xlane.xlu1 %2354 }
 0xd41   :  { %v2357_v4 = vmul.f32 0.03125, %v2355_v3  ;;  %v2360_v31 = vmul.f32 %v2358_v30, %v2358_v30 }
 0xd43   :  { %v2359_v36 = vsub.f32 %v2347_v26, %v2357_v4  ;;  %v2362_v60 = vsel %vm96_vm1, %v2360_v31, 0.0 }
 0xd44   :  { %2363 = vadd.xlane.f32.xlu0 %v2362_v60 }
 0xd45   :  { %v2361_v37 = vmul.f32 %v2359_v36, %v2359_v36 }
 0xd47   :  { %v2365_v38 = vsel %vm96_vm1, %v2361_v37, 0.0 }
 0xd48   :  { %2366 = vadd.xlane.f32.xlu0 %v2365_v38 }
 0xdcd   :  { %v2364_v42 = vpop.xlane.xlu0 %2363 }
 0xdce   :  { %v2368_v43 = vmul.f32 0.03125, %v2364_v42 }
 0xdd0   :  { %v2370_v44 = vadd.f32 1e-05, %v2368_v43 }
 0xdd1   :  { %v2367_v45 = vpop.xlane.xlu0 %2366 }
 0xdd2   :  { %3195 = vrsqrt.f32 %v2370_v44  ;;  %v2369_v28 = vmul.f32 0.03125, %v2367_v45 }
 0xdd4   :  { %v2371_v40 = vadd.f32 1e-05, %v2369_v28 }
 0xdd6   :  { %3197 = vrsqrt.f32 %v2371_v40 }
 0xddf   :  { %v3196_v33 = vpop.eup %3195 }
 0xde0   :  { %v2374_v48 = vmul.f32 %v3196_v33, %v2358_v30 }
 0xde2   :  { %v2380_v51 = vmul.f32 %v2669_v49, %v2374_v48 }
 0xde3   :  { %v3198_v50 = vpop.eup %3197 }
 0xde4   :  { %v2375_v46 = vmul.f32 %v3198_v50, %v2359_v36  ;;  %v2386_v54 = vadd.f32 %v2670_v52, %v2380_v51 }
 0xde6   :  { %v2381_v53 = vmul.f32 %v2669_v49, %v2375_v46 }
 0xde8   :  { %v2387_v55 = vadd.f32 %v2670_v52, %v2381_v53 }
 0xdea   :  { %v2392_v29 = vpack.c.bf16 %v2387_v55, %v2386_v54 }
 0xdec   :  { %3007 = vmatmul.mubr.msk.bf16.vlgmr.msra.gmra.mxu1 %vm96_vm1, %v2392_v29 }
 0xeac   :  { %v2447_v59 = vpop.f32.mrf.mxu1 }
 0xead   :  { %v2448_v63 = vadd.f32 %v2671_v58, %v2447_v59 }
 0xeae   :  { %v3008_v62 = vpop.f32.mrf.mxu1 }
 0xeaf   :  { %v2454_v5 = vmax.f32 %v2448_v63, 0.0 }
 0xeb0   :  { %v2450_v1 = vpop.f32.mrf.mxu1 }
 0xeb1   :  { %v2451_v2 = vadd.f32 %v2671_v58, %v2450_v1 }
 0xeb2   :  { %v3009_v34 = vpop.f32.mrf.mxu1 }
 0xeb3   :  { %v2455_v6 = vmax.f32 %v2451_v2, 0.0 }
 0xeb5   :  { %v2464_v35 = vpack.c.bf16 %v2455_v6, %v2454_v5 }
 0xeb7   :  { %3019 = vmatmul.mubr.msk.bf16.vlgmr.msra.gmra.mxu0 %vm2494_vm7, %v2464_v35 }
 0xf77   :  { %v2532_v7 = vpop.f32.mrf.mxu0 }
 0xf78   :  { %v2533_v9 = vadd.f32 %v2675_v0, %v2532_v7 }
 0xf79   :  { %v3020_v10 = vpop.f32.mrf.mxu0 }
 0xf7a   :  { %v2539_v11 = vadd.f32 %v2533_v9, %v2386_v54 }
 0xf7b   :  { %v2535_v20 = vpop.f32.mrf.mxu0 }
 0xf7c   :  { %v2536_v21 = vadd.f32 %v2675_v0, %v2535_v20  ;;  %v2543_v12 = vsel %vm96_vm1, %v2539_v11, 0.0 }
 0xf7d   :  { %2544 = vadd.xlane.f32.xlu1 %v2543_v12  ;;  %v3021_v8 = vpop.f32.mrf.mxu0 }
 0xf7e   :  { %v2540_v13 = vadd.f32 %v2536_v21, %v2387_v55 }
 0xf80   :  { %v2546_v14 = vsel %vm96_vm1, %v2540_v13, 0.0 }
 0xf81   :  { %2547 = vadd.xlane.f32.xlu0 %v2546_v14 }
0x1006   :  { %v2545_v15 = vpop.xlane.xlu1 %2544 }
0x1007   :  { %v2549_v16 = vmul.f32 0.03125, %v2545_v15 }
0x1009   :  { %v2551_v17 = vsub.f32 %v2539_v11, %v2549_v16 }
0x100a   :  { %v2548_v18 = vpop.xlane.xlu0 %2547 }
0x100b   :  { %v2550_v22 = vmul.f32 0.03125, %v2548_v18  ;;  %v2553_v23 = vmul.f32 %v2551_v17, %v2551_v17 }
0x100d   :  { %v2552_v32 = vsub.f32 %v2540_v13, %v2550_v22  ;;  %v2555_v19 = vsel %vm96_vm1, %v2553_v23, 0.0 }
0x100e   :  { %2556 = vadd.xlane.f32.xlu1 %v2555_v19 }
0x100f   :  { %v2554_v26 = vmul.f32 %v2552_v32, %v2552_v32 }
0x1011   :  { %v2558_v47 = vsel %vm96_vm1, %v2554_v26, 0.0 }
0x1012   :  { %2559 = vadd.xlane.f32.xlu0 %v2558_v47 }
0x1013   :  { %3214 = shalt.err (!%p3211_p4)
}
0x1014   :  { %s3261_s12 = smov 128   ;;  %v2681_v60 = vld [vmem:[%s3854_s5 + $0xa] ss:$0 sm:$0xff]  ;;  %v2682_v38 = vld [vmem:[%s3854_s5 + $0xb] ss:$0 sm:$0xff] }
0x1015   :  { %2608 = dma.vmem_to_hbm [thread:$0]  %s2603_s1, 256, %s3856_s7, [#allocation5], %s3261_s12, %s3261_s12, %s3257_s19  }
0x1016   :  { %s3262_s7 = smov [#allocation2]  }
0x1017   :  { %s2590_s24 = sshll.u32 %s3262_s7, 4  ;;  %s2591_s24 = int_to_ptr.vmem [resolvable:$true] %s2590_s24 }
0x1018   :  { %s3223_s25 = scalar_lea.vmem %s2591_s24, 256  ;;  %p3228_p6 = scmp.lt.s32.totalorder %s2591_s24, %s2591_s24 }
0x1019   :  { %p3224_p5 = scmp.ne.s32.totalorder %s2591_s24, %s3223_s25  ;;  %p3229_p7 = scmp.lt.s32.totalorder %s3223_s25, %s3223_s25 }
0x101b   :  { %p3230_p8 = por %p3229_p7, %p3228_p6 }
0x101d   :  { %p3231_p9 = pnand %p3230_p8, %p3224_p5 }
0x1097   :  { %v2557_v25 = vpop.xlane.xlu1 %2556 }
0x1098   :  { %v2561_v27 = vmul.f32 0.03125, %v2557_v25 }
0x109a   :  { %v2563_v30 = vadd.f32 1e-05, %v2561_v27 }
0x109b   :  { %v2560_v3 = vpop.xlane.xlu0 %2559 }
0x109c   :  { %3199 = vrsqrt.f32 %v2563_v30  ;;  %v2562_v4 = vmul.f32 0.03125, %v2560_v3 }
0x109e   :  { %v2564_v31 = vadd.f32 1e-05, %v2562_v4 }
0x10a0   :  { %3201 = vrsqrt.f32 %v2564_v31 }
0x10a9   :  { %v3200_v36 = vpop.eup %3199 }
0x10aa   :  { %v2567_v37 = vmul.f32 %v3200_v36, %v2551_v17 }
0x10ac   :  { %v2573_v61 = vmul.f32 %v2681_v60, %v2567_v37 }
0x10ad   :  { %v3202_v39 = vpop.eup %3201 }
0x10ae   :  { %v2568_v41 = vmul.f32 %v3202_v39, %v2552_v32  ;;  %v2579_v42 = vadd.f32 %v2682_v38, %v2573_v61 }
0x10b0   :  { %v2574_v43 = vmul.f32 %v2681_v60, %v2568_v41  ;;  %2581 = vst.msk [vmem:[#allocation2] sm:$0xff] %vm96_vm1, %v2579_v42 }
0x10b2   :  { %v2580_v44 = vadd.f32 %v2682_v38, %v2574_v43 }
0x10b4   :  { %2582 = vst.msk [vmem:[#allocation2 + $0x8] sm:$0xff] %vm96_vm1, %v2580_v44 }
0x10b5   :  { %3234 = shalt.err (!%p3231_p9)
}
0x10b6   :  { %2596 = dma.vmem_to_hbm [thread:$0]  %s2591_s24, 256, %s3855_s6, [#allocation3], %s3261_s12, %s3261_s12, %s3257_s19  }
0x10b7   :  { %3243 = dma.done.wait [#allocation3], 256  }
0x10b8   :  { %3244 = vsyncadd [#allocation3], 4294967040 }
0x10b9   :  { %3245 = dma.done.wait [#allocation5], 256  }
0x10ba   :  { %3246 = vsyncadd [#allocation5], 4294967040 }
0x10bb   :  { %2615 = vsyncpa [#allocation3], 1 }
0x10bc   :  { %2616 = vsyncpa [#allocation5], 1 }

</bundles_post_ra>
